<compile_context>
chip_gen: v7x
topology: tpu7x:2x2x1
jax: 0.10.0
libtpu: 0.0.40
codegen_flags: <defaults>
</compile_context>

<pallas_src>
import jax
import jax.numpy as jnp
from jax import lax
from jax.experimental import pallas as pl
from jax.experimental.pallas import tpu as pltpu

_MIB = 1024 * 1024


# ----------------------------------------------------------------------------
# Hardware-aware sizing helpers
# ----------------------------------------------------------------------------
def _sublane_tile(dtype) -> int:
    """Second-to-last-dim tile for a dtype: 8 (f32), 16 (bf16/f16), 32 (int8)."""
    itemsize = jnp.dtype(dtype).itemsize
    return max(8, (8 * 4) // max(1, itemsize))


def _vmem_capacity_bytes() -> int:
    """Physical VMEM of the attached TPU; conservative (v7x 64 MiB) fallback."""
    try:
        return int(pltpu.get_tpu_info().vmem_capacity_bytes)
    except Exception:  # interpret mode / older runtimes
        return 64 * _MIB


def _choose_h_tile(b, h, c, w, dtype, vmem_capacity):
    """Pick h_tile (and required H padding) from the VMEM budget.

    Resident bytes per grid step ~= 2x input block + 2x output block (same
    size) = 4x input block, plus a small chunked interleave temporary.
    Returns (h_tile, h_pad) where h_pad is extra rows to pad onto H.
    """
    itemsize = jnp.dtype(dtype).itemsize
    sub = _sublane_tile(dtype)
    row_bytes = c * w * itemsize            # one input h-row == one output h-row
    budget = int(vmem_capacity * 0.7)       # leave headroom for temps/scratch
    max_in_block = min(budget // 4, 16 * _MIB)
    max_rows = max(1, max_in_block // max(1, row_bytes))

    cands = [d for d in range(1, h + 1)
             if h % d == 0 and d <= max_rows and (d % sub == 0 or d == h)]
    if cands:
        # Prefer tiles giving an even (>= 2) total grid-step count so v7x's
        # two TensorCores both get work; among those take the largest tile.
        even = [d for d in cands if (b * (h // d)) >= 2 and (b * (h // d)) % 2 == 0]
        pool = even if even else cands
        return max(pool), 0
    # No sublane-aligned divisor fits the budget: pad H to a multiple of an
    # aligned tile (wrapper slices the padded rows back off).
    tile = max(sub, (max_rows // sub) * sub)
    h_pad = (-(-h // tile)) * tile - h
    return tile, h_pad


def _choose_h_chunk(h_tile, out_c, r, w, itemsize, sub, target_bytes=128 * 1024):
    """Largest sublane-aligned divisor of h_tile keeping one interleave
    temporary (out_c * h_chunk * r*w elements) around/below target_bytes."""
    z_row_bytes = max(1, out_c * r * w * itemsize)
    max_rows = max(1, target_bytes // z_row_bytes)
    best = None
    for d in range(1, h_tile + 1):
        if h_tile % d == 0 and d % sub == 0 and d <= max_rows:
            best = d
    return best if best is not None else h_tile


# ----------------------------------------------------------------------------
# Kernel
# ----------------------------------------------------------------------------
def _make_d2s_kernel(r: int, out_c: int, w: int, h_tile: int, h_chunk: int):
    """Kernel specialized for (r, out_c, w, h_tile, h_chunk); r is tiny."""
    out_w = r * w
    n_chunks = h_tile // h_chunk

    def interleave_store(x_ref, o_ref, h0, rows):
        # o[:, :, h0:h0+rows, rh*out_w + iw*r + rw] =
        #     x[:, (rh*r + rw)*out_c : +out_c, h0:h0+rows, iw]
        for rh in range(r):
            parts = []
            for rw in range(r):
                c0 = (rh * r + rw) * out_c
                # Static channel slice straight from the ref (major-axis slice).
                parts.append(x_ref[:, c0:c0 + out_c, pl.ds(h0, rows), :])
            # In-register W-interleave of the rw phases for this h-chunk only.
            z = jnp.stack(parts, axis=-1).reshape(1, out_c, rows, out_w)
            # Lane-dense contiguous store of width r*w at lane offset rh*out_w.
            o_ref[:, :, pl.ds(h0, rows), rh * out_w:(rh + 1) * out_w] = z

    def kernel(x_ref, o_ref):
        # x_ref: (1, c, h_tile, w) VMEM
        # o_ref: (1, out_c, h_tile, r*r*w) VMEM (flattened-H output view)
        if n_chunks == 1:
            interleave_store(x_ref, o_ref, 0, h_tile)
        else:
            # Rolled loop bounds the live range of the interleave temporary to
            # one h-chunk (keeps VMEM free for bigger HBM blocks).
            def body(ci, carry):
                h0 = pl.multiple_of(ci * h_chunk, h_chunk)
                interleave_store(x_ref, o_ref, h0, h_chunk)
                return carry
            lax.fori_loop(0, n_chunks, body, 0)

    return kernel


# ----------------------------------------------------------------------------
# Pallas entry point
# ----------------------------------------------------------------------------
def depth2space_pallas(x, r=2, *, h_tile=None, h_chunk=None):
    b, c, h, w = x.shape
    assert c % (r * r) == 0, "channels must be divisible by r**2"
    out_c = c // (r * r)
    out_w = r * w
    itemsize = jnp.dtype(x.dtype).itemsize
    sub = _sublane_tile(x.dtype)
    vmem_cap = _vmem_capacity_bytes()

    pad = 0
    if h_tile is None:
        h_tile, pad = _choose_h_tile(b, h, c, w, x.dtype, vmem_cap)
    else:
        assert h % h_tile == 0, "h_tile must divide h"
        assert h_tile % sub == 0 or h_tile == h, "h_tile must be sublane-aligned or == h"

    h_run = h + pad
    x_run = x if pad == 0 else jnp.pad(x, ((0, 0), (0, 0), (0, pad), (0, 0)))
    n_ht = h_run // h_tile

    if h_chunk is None:
        h_chunk = _choose_h_chunk(h_tile, out_c, r, w, itemsize, sub)
    else:
        assert h_tile % h_chunk == 0, "h_chunk must divide h_tile"
        assert h_chunk % sub == 0 or h_chunk == h_tile

    kernel = _make_d2s_kernel(r, out_c, w, h_tile, h_chunk)

    # VMEM actually resident per step: double-buffered in + out blocks (equal
    # byte counts) plus interleave/scratch slack; clamp to physical capacity.
    block_bytes = c * h_tile * w * itemsize
    vmem_limit = int(min(max(4 * block_bytes + 8 * _MIB, 32 * _MIB),
                         vmem_cap * 7 // 8))

    out_view = pl.pallas_call(
        kernel,
        out_shape=jax.ShapeDtypeStruct((b, out_c, h_run, r * out_w), x.dtype),
        grid_spec=pltpu.PrefetchScalarGridSpec(
            num_scalar_prefetch=0,
            grid=(b, n_ht),
            in_specs=[
                pl.BlockSpec((1, c, h_tile, w), lambda bi, hi: (bi, 0, hi, 0)),
            ],
            out_specs=pl.BlockSpec((1, out_c, h_tile, r * out_w),
                                   lambda bi, hi: (bi, 0, hi, 0)),
        ),
        compiler_params=pltpu.CompilerParams(
            dimension_semantics=("parallel", "parallel"),
            vmem_limit_bytes=vmem_limit,
        ),
    )(x_run)

    # Metadata-only reshape: (h_run, r*out_w) -> (r*h_run, out_w) is row-major
    # exact; padded rows (if any) land at the end and are sliced off.
    out = out_view.reshape(b, out_c, r * h_run, out_w)
    if pad:
        out = out[:, :, : r * h, :]
    return out


# ----------------------------------------------------------------------------
# Reference + public wrapper
# ----------------------------------------------------------------------------
def _reference_depth2space(x, r=2):
    """Pure-JAX reference mirroring the PyTorch view/permute/view."""
    b, c, h, w = x.shape
    out_c = c // (r * r)
    x_view = x.reshape(b, r, r, out_c, h, w)
    x_prime = jnp.transpose(x_view, (0, 3, 4, 1, 5, 2))
    return x_prime.reshape(b, out_c, h * r, w * r)


_MIN_PALLAS_BYTES = 1 * _MIB   # below ~1 MiB launch overhead dominates
_MIN_PALLAS_W = 64             # below this, stores are < 128 lanes wide (masked)


def depth2space(x, r=2, *, h_tile=None, h_chunk=None):
    """Public wrapper: tiny tensors and narrow-w shapes use the XLA path
    (per-step overhead / masked sub-128-lane stores make Pallas slower there);
    everything else goes to the Pallas kernel."""
    b, c, h, w = x.shape
    if x.size * jnp.dtype(x.dtype).itemsize < _MIN_PALLAS_BYTES or w < _MIN_PALLAS_W:
        return _reference_depth2space(x, r)
    return depth2space_pallas(x, r, h_tile=h_tile, h_chunk=h_chunk)


# ----------------------------------------------------------------------------
# Tests
# ----------------------------------------------------------------------------
if __name__ == "__main__":
    key = jax.random.PRNGKey(0)
    k1, k2, k3 = jax.random.split(key, 3)

    # 1) Small shape consistent with the module; exercises the Pallas kernel
    #    directly (the public wrapper would route this shape to the reference).
    x_small = jax.random.normal(k1, (2, 4, 16, 16), dtype=jnp.float32)
    out_small = jax.block_until_ready(depth2space_pallas(x_small, r=2))
    ref_small = _reference_depth2space(x_small, r=2)
    assert out_small.shape == ref_small.shape == (2, 1, 32, 32)
    assert out_small.dtype == ref_small.dtype
    assert jnp.array_equal(out_small, ref_small), "Pallas Depth2Space mismatch (small)"
    # Wrapper routing check (reference path for tiny/narrow shapes).
    assert jnp.array_equal(depth2space(x_small, r=2), ref_small)

    # 2) Lane-dense shape exercising H-tiling (grid (1, 2)) and the in-kernel
    #    chunked interleave loop (fori_loop over 4 h-chunks of 16 rows).
    x_mid = jax.random.normal(k2, (1, 8, 128, 128), dtype=jnp.float32)
    out_mid = jax.block_until_ready(
        depth2space_pallas(x_mid, r=2, h_tile=64, h_chunk=16))
    ref_mid = _reference_depth2space(x_mid, r=2)
    assert out_mid.shape == ref_mid.shape == (1, 2, 256, 256)
    assert jnp.array_equal(out_mid, ref_mid), "Pallas Depth2Space mismatch (tiled)"

    # 3) h not a multiple of the f32 sublane tile: full-h block path.
    x_odd = jax.random.normal(k3, (2, 4, 20, 64), dtype=jnp.float32)
    out_odd = jax.block_until_ready(depth2space_pallas(x_odd, r=2))
    ref_odd = _reference_depth2space(x_odd, r=2)
    assert out_odd.shape == ref_odd.shape == (2, 1, 40, 128)
    assert jnp.array_equal(out_odd, ref_odd), "Pallas Depth2Space mismatch (odd h)"

    print("KERNEL_OK")
</pallas_src>

<mosaic_0001>
module attributes {stable_mosaic.version = 11 : i64} {
  func.func @kernel(%arg0: i32, %arg1: i32, %arg2: memref<1x4x16x16xf32, #tpu.memory_space<vmem>>, %arg3: memref<1x1x16x64xf32, #tpu.memory_space<vmem>>) attributes {dimension_semantics = [#tpu.dimension_semantics<parallel>, #tpu.dimension_semantics<parallel>], iteration_bounds = array<i64: 2, 1>, scalar_prefetch = 0 : i64, scratch_operands = 0 : i64, tpu.core_type = #tpu.core_type<tc>, window_params = [{transform_indices = @transform_0, window_bounds = array<i64: 1, 4, 16, 16>}, {transform_indices = @transform_1, window_bounds = array<i64: 1, 1, 16, 64>}]} {
    %c0 = arith.constant 0 : index
    %c0_0 = arith.constant 0 : index
    %c0_1 = arith.constant 0 : index
    %c0_2 = arith.constant 0 : index
    %0 = vector.load %arg2[%c0, %c0_0, %c0_1, %c0_2] : memref<1x4x16x16xf32, #tpu.memory_space<vmem>>, vector<1x1x16x16xf32>
    %c0_3 = arith.constant 0 : index
    %c1 = arith.constant 1 : index
    %c0_4 = arith.constant 0 : index
    %c0_5 = arith.constant 0 : index
    %1 = vector.load %arg2[%c0_3, %c1, %c0_4, %c0_5] : memref<1x4x16x16xf32, #tpu.memory_space<vmem>>, vector<1x1x16x16xf32>
    %2 = vector.shape_cast %0 : vector<1x1x16x16xf32> to vector<1x1x16x16x1xf32>
    %3 = vector.shape_cast %1 : vector<1x1x16x16xf32> to vector<1x1x16x16x1xf32>
    %4 = tpu.concatenate %2, %3 in 4 : vector<1x1x16x16x1xf32>, vector<1x1x16x16x1xf32> -> vector<1x1x16x16x2xf32>
    %5 = vector.shape_cast %4 : vector<1x1x16x16x2xf32> to vector<1x1x16x32xf32>
    %c0_6 = arith.constant 0 : index
    %c0_7 = arith.constant 0 : index
    %c0_8 = arith.constant 0 : index
    %c0_9 = arith.constant 0 : index
    %6 = vector.load %arg3[%c0_6, %c0_7, %c0_8, %c0_9] : memref<1x1x16x64xf32, #tpu.memory_space<vmem>>, vector<1x1x16x32xf32>
    tpu.vector_store %arg3[%c0_6, %c0_7, %c0_8, %c0_9], %5 {strides = array<i32>} : memref<1x1x16x64xf32, #tpu.memory_space<vmem>>, vector<1x1x16x32xf32>,
    %c0_10 = arith.constant 0 : index
    %c2 = arith.constant 2 : index
    %c0_11 = arith.constant 0 : index
    %c0_12 = arith.constant 0 : index
    %7 = vector.load %arg2[%c0_10, %c2, %c0_11, %c0_12] : memref<1x4x16x16xf32, #tpu.memory_space<vmem>>, vector<1x1x16x16xf32>
    %c0_13 = arith.constant 0 : index
    %c3 = arith.constant 3 : index
    %c0_14 = arith.constant 0 : index
    %c0_15 = arith.constant 0 : index
    %8 = vector.load %arg2[%c0_13, %c3, %c0_14, %c0_15] : memref<1x4x16x16xf32, #tpu.memory_space<vmem>>, vector<1x1x16x16xf32>
    %9 = vector.shape_cast %7 : vector<1x1x16x16xf32> to vector<1x1x16x16x1xf32>
    %10 = vector.shape_cast %8 : vector<1x1x16x16xf32> to vector<1x1x16x16x1xf32>
    %11 = tpu.concatenate %9, %10 in 4 : vector<1x1x16x16x1xf32>, vector<1x1x16x16x1xf32> -> vector<1x1x16x16x2xf32>
    %12 = vector.shape_cast %11 : vector<1x1x16x16x2xf32> to vector<1x1x16x32xf32>
    %c0_16 = arith.constant 0 : index
    %c0_17 = arith.constant 0 : index
    %c0_18 = arith.constant 0 : index
    %c32 = arith.constant 32 : index
    %13 = vector.load %arg3[%c0_16, %c0_17, %c0_18, %c32] : memref<1x1x16x64xf32, #tpu.memory_space<vmem>>, vector<1x1x16x32xf32>
    tpu.vector_store %arg3[%c0_16, %c0_17, %c0_18, %c32], %12 {strides = array<i32>} : memref<1x1x16x64xf32, #tpu.memory_space<vmem>>, vector<1x1x16x32xf32>,
    return
  }
  func.func @transform_0(%arg0: i32, %arg1: i32) -> (i32, i32, i32, i32) {
    %c0_i32 = arith.constant 0 : i32
    %c0_i32_0 = arith.constant 0 : i32
    %c0_i32_1 = arith.constant 0 : i32
    return %arg0, %c0_i32, %arg1, %c0_i32_0 : i32, i32, i32, i32
  }
  func.func @transform_1(%arg0: i32, %arg1: i32) -> (i32, i32, i32, i32) {
    %c0_i32 = arith.constant 0 : i32
    %c0_i32_0 = arith.constant 0 : i32
    %c0_i32_1 = arith.constant 0 : i32
    return %arg0, %c0_i32, %arg1, %c0_i32_0 : i32, i32, i32, i32
  }
}

</mosaic_0001>

<bundles_post_ra>
// kernel: tpu_custom_call.1
= control target key start
LH: loop header
LB: loop body
LE: loop exit
PB: predicated region body
PF: predicated region fallthrough
CT: control target
= control target key end

     0   :  { %6 = vsyncpa [#allocation3], 0  ;;  %s3870_s0 = inlined_call_operand.hbm [shape: f32[2,4,16,16], index: 0, kind: input, shape index: {}]   ;;  %s3871_s1 = inlined_call_operand.hbm [shape: f32[2,1,16,64], index: 1, kind: output, shape index: {}]  }
   0x1   :  { %8 = vsyncpa [#allocation3 + $0x1], 0 }
   0x2   :  { %9 = vsyncpa [#allocation4], 0 }
   0x3   :  { %11 = vsyncpa [#allocation4 + $0x1], 0  ;;  %s2708_s6 = smov 0   ;;  %s2710_s7 = smov 0  }
   0x4   :  { %s2712_s8 = smov 0   ;;  %s2714_s9 = smov 0  }
   0x5   :  { %s2716_s10 = smov 0   ;;  %s2718_s11 = smov 0  }
   0x6 LB: > { %s2455_s12 = sadd.s32 4294967295, %s2673_s11   ;;  %s2456_s13 = sadd.s32 4294967294, %s2673_s11   ;;  %s2673_s11 = sphi %s2718_s11, %s17_s11   ;;  %s2669_s10 = sphi %s2716_s10, %s3939_s10   ;;  %s2665_s9 = sphi %s2714_s9, %s3938_s9   ;;  %s2661_s8 = sphi %s2712_s8, %s3937_s8   ;;  %s2657_s7 = sphi %s2710_s7, %s3936_s7   ;;  %s2653_s6 = sphi %s2708_s6, %s3935_s6  }
   0x7   : > { %s29_s14 = sadd.s32 1, %s2669_s10  ;;  %s38_s15 = sadd.s32 1, %s2661_s8 }
   0x8   : > { %p31_p0 = scmp.ge.s32.totalorder %s29_s14, 2  ;;  %p45_p1 = scmp.ne.s32.totalorder %s2661_s8, %s2657_s7 }
   0x9   : > { %p46_p2 = scmp.eq.s32.totalorder %s2673_s11, 0  ;;  %p51_p3 = scmp.ne.s32.totalorder %s2657_s7, %s2653_s6 }
   0xa   : > { %s3941_s14 = smov (%p31_p0, %s29_s14), 0  ;;  %p52_p5 = scmp.eq.s32.totalorder %s2455_s12, 0 }
   0xb   : > { %p2749_p4 = por %p46_p2, %p45_p1  ;;  %s33_s17 = ssub.s32 %s2669_s10, %s3941_s14 }
   0xc   : > { %p77_p6 = scmp.eq.s32.totalorder %s2455_s12, 1  ;;  %p36_p7 = scmp.eq.s32.totalorder %s33_s17, 0 }
   0xd   : > { %p2755_p8 = por %p52_p5, %p51_p3  ;;  %p83_p10 = scmp.eq.s32.totalorder %s2456_s13, 1 }
   0xe   : > { %p2759_p9 = por %p77_p6, %p45_p1  ;;  %p2490_p13 = scmp.lt.s32.totalorder %s2673_s11, 2 }
   0xf   : > { %s2764_s20 = scalar_select %p36_p7, %s2661_s8, %s38_s15  }
  0x10   : > { %s3883_s19 = scalar_select %p2759_p9, 1, 0 }
  0x11   : > { %p2766_p11 = por %p83_p10, %p51_p3  ;;  %s103_s22 = sand.u32 1, %s2661_s8  }
  0x12   : > { %s2459_s23 = sshll.u32 %s103_s22, 6  ;;  %s2476_s24 = sshll.u32 %s2669_s10, 10 }
  0x13   : > { %s3884_s21 = scalar_select %p2766_p11, 1, 0 }
  0x14   : > { %s2777_s27 = scalar_lea.hbm %s3870_s0, %s2476_s24  ;;  %s107_s28 = scalar_lea.vmem [#allocation2], %s2459_s23 }
  0x15   : > { %s116_s29 = sshll.u32 %s107_s28, 4  ;;  %p2783_p0 = pnand %p2490_p13, %p2749_p4  ;;  %s2779_s29 = int_to_ptr.vmem [resolvable:$true] %s116_s29 }
  0x16   : > { %s2788_s2 = scalar_lea.sflag [#allocation3], %s103_s22  ;;  %s2561_s3 = scalar_lea.hbm %s2777_s27, 1024 }
  0x17   : > { %p2562_p2 = scmp.ne.s32.totalorder %s2777_s27, %s2561_s3  ;;  %p2563_p3 = pneg %p2783_p0 }
  0x18   : > { %s2566_s12 = scalar_lea.hbm %s3870_s0, 2048  ;;  %p2567_p4 = scmp.lt.u32.totalorder %s2777_s27, %s3870_s0 }
  0x19   : > { %p2564_p5 = pnand %p2563_p3, %p2562_p2  ;;  %p2568_p7 = scmp.lt.u32.totalorder %s2566_s12, %s2561_s3 }
  0x1a   : > { %p2570_p13 = scmp.lt.u32.totalorder %s2561_s3, %s2777_s27 }
  0x1b   : > { %p2565_p6 = pneg %p2564_p5  ;;  %p2569_p10 = por %p2568_p7, %p2567_p4 }
  0x1d   : > { %p2571_p12 = por %p2570_p13, %p2569_p10 }
  0x1f   : > { %p2572_p1 = pnand %p2571_p12, %p2565_p6 }
  0x21   : > { %2575 = shalt.err (!%p2572_p1)
}
  0x22   : > { %s2576_s16 = scalar_lea.vmem %s2779_s29, 1024  ;;  %s2675_s17 = smov [#allocation2]  }
  0x23   : > { %p2577_p2 = scmp.ne.s32.totalorder %s2779_s29, %s2576_s16  ;;  %s2581_s22 = sshll.u32 %s2675_s17, 4  ;;  %s2582_s22 = int_to_ptr.vmem [resolvable:$false] %s2581_s22 }
  0x24   : > { %s2583_s23 = scalar_lea.vmem %s2582_s22, 2048  ;;  %p2584_p9 = scmp.lt.s32.totalorder %s2779_s29, %s2582_s22 }
  0x25   : > { %p2579_p5 = pnand %p2577_p2, %p2563_p3  ;;  %p2585_p4 = scmp.lt.s32.totalorder %s2583_s23, %s2576_s16 }
  0x27   : > { %p2580_p11 = pneg %p2579_p5  ;;  %p2586_p7 = por %p2585_p4, %p2584_p9 }
  0x29   : > { %p2587_p10 = pnand %p2586_p7, %p2580_p11 }
  0x2b   : > { %2590 = shalt.err (!%p2587_p10)
}
  0x2c   : > { %s2676_s24 = smov 128   ;;  %s2677_s25 = smov 8  }
  0x2d   : > { %2485 = dma.hbm_to_vmem [thread:$0]  (!%p2783_p0), %s2777_s27, 1024, %s2779_s29, %s2788_s2, %s2676_s24, %s2676_s24, %s2677_s25  }
  0x2e   : > { %p124_p12 = scmp.lt.s32.totalorder %s2673_s11, 3  ;;  %p3886_p1 = scmp.ge.s32.totalorder %s2673_s11, 1 }
  0x30   : > { %p125_p3 = pnand %p3886_p1, %p124_p12 }
  0x32   : > { %128 = sbr.rel (%p125_p3) target bundleno = 895 (0x37f), region = 24 }
  0x39   : > { %s2820_s26 = sand.u32 1, %s2657_s7  }
  0x3a   : > { %s2463_s28 = sshll.u32 %s2820_s26, 6  ;;  %s131_s3 = scalar_lea.sflag [#allocation3], %s2820_s26 }
  0x3b   : > { %s2824_s4 = scalar_lea.vmem [#allocation2], %s2463_s28 }
  0x3c   : > { %2644 = dma.done.wait (%p2755_p8), %s131_s3, 1024  }
  0x3d   : > { %2646 = vsyncadd (%p2755_p8), %s131_s3, 4294966272  ;;  %v160_v0 = vlaneseq  ;;  %v155_v4 = vld [vmem:[%s2824_s4] sm:$0xff]  ;;  %v156_v19 = vld [vmem:[%s2824_s4 + $0x8] sm:$0xff]  ;;  %vm512_vm0 = vcmask 7168   ;;  %s2680_s18 = smov 2   ;;  %s2681_s27 = smov 4  }
  0x3e   : > { %v2465_v28 = vld [vmem:[%s2824_s4 + $0x10] sm:$0xff]  ;;  %v2466_v37 = vld [vmem:[%s2824_s4 + $0x18] sm:$0xff]  ;;  %s2682_s29 = smov 6   ;;  %s2683_s30 = smov 8   ;;  %vm1209_vm1 = vcmask 15360   ;;  %vm1212_vm2 = vcmask 31744  }
  0x3f   : > { %v2830_v1 = vshrl.u32 %v160_v0, 7  ;;  %s2684_s2 = smov 10   ;;  %s2685_s5 = smov 12   ;;  %vm1215_vm3 = vcmask 48128   ;;  %vm1218_vm4 = vcmask 64512   ;;  %vm1221_vm5 = vcmask 80896  }
  0x40   : > { %s2686_s12 = smov 14   ;;  %s2687_s13 = smov 16   ;;  %vm1224_vm6 = vcmask 97280   ;;  %vm1227_vm7 = vcmask 113664   ;;  %vm1230_vm8 = vcmask 130048   ;;  %vm1233_vm9 = vcmask 146432  }
  0x41   : > { %v2833_v2 = vsub.s32 1, %v2830_v1  ;;  %v2836_v3 = vsub.s32 0, %v2830_v1  ;;  %v2842_v7 = vsub.s32 2, %v2830_v1  ;;  %v2846_v9 = vsub.s32 3, %v2830_v1  ;;  %s2688_s15 = smov 18   ;;  %s2689_s16 = smov 20  }
  0x42   : > { %v2850_v11 = vsub.s32 4, %v2830_v1  ;;  %v2854_v13 = vsub.s32 5, %v2830_v1  ;;  %v2858_v15 = vsub.s32 6, %v2830_v1  ;;  %v2862_v17 = vsub.s32 7, %v2830_v1  ;;  %s2690_s17 = smov 22   ;;  %s2691_s22 = smov 24  }
  0x43   : > { %v174_v5 = vrot.slane %v155_v4, %v2833_v2  ;;  %v163_v6 = vrot.slane %v155_v4, %v2836_v3  ;;  %v185_v8 = vrot.slane %v155_v4, %v2842_v7  ;;  %3887 = vst [vmem:[#allocation8_spill] sm:$0xff] %v2846_v9  ;;  %v196_v10 = vrot.slane %v155_v4, %v2846_v9  ;;  %s2692_s23 = smov 26   ;;  %s2693_s24 = smov 28  }
  0x44   : > { %v207_v12 = vrot.slane %v155_v4, %v2850_v11  ;;  %3888 = vst [vmem:[#allocation9_spill] sm:$0xff] %v2854_v13  ;;  %v218_v14 = vrot.slane %v155_v4, %v2854_v13  ;;  %v229_v16 = vrot.slane %v155_v4, %v2858_v15  ;;  %3889 = vst [vmem:[#allocation10_spill] sm:$0xff] %v2862_v17  ;;  %s2694_s25 = smov 30   ;;  %vm1236_vm10 = vcmask 162816   ;;  %s2695_s28 = smov 32  }
  0x45   : > { %176 = vbcast.lane.b32.xlu1 %v174_v5, 256  ;;  %165 = vbcast.lane.b32.xlu0 %v163_v6, 256  ;;  %v240_v18 = vrot.slane %v155_v4, %v2862_v17  ;;  %v251_v20 = vrot.slane %v156_v19, %v2836_v3  ;;  %v262_v21 = vrot.slane %v156_v19, %v2833_v2  ;;  %vm1239_vm11 = vcmask 179200   ;;  %s2464_s3 = sshll.u32 %s2820_s26, 4  ;;  %p3932_p9 = scmp.ne.s32.totalorder %s3883_s19, 0 }
  0x46   : > { %v273_v22 = vrot.slane %v156_v19, %v2842_v7  ;;  %v284_v23 = vrot.slane %v156_v19, %v2846_v9  ;;  %v295_v24 = vrot.slane %v156_v19, %v2850_v11  ;;  %v306_v25 = vrot.slane %v156_v19, %v2854_v13 }
  0x47   : > { %v317_v26 = vrot.slane %v156_v19, %v2858_v15  ;;  %v328_v27 = vrot.slane %v156_v19, %v2862_v17  ;;  %v339_v29 = vrot.slane %v2465_v28, %v2836_v3  ;;  %v350_v30 = vrot.slane %v2465_v28, %v2833_v2 }
  0x48   : > { %v361_v31 = vrot.slane %v2465_v28, %v2842_v7  ;;  %v372_v32 = vrot.slane %v2465_v28, %v2846_v9  ;;  %v383_v33 = vrot.slane %v2465_v28, %v2850_v11  ;;  %v394_v34 = vrot.slane %v2465_v28, %v2854_v13 }
  0x49   : > { %180 = vbcast.lane.b32.xlu1 %v174_v5, 264  ;;  %169 = vbcast.lane.b32.xlu0 %v163_v6, 264  ;;  %v405_v35 = vrot.slane %v2465_v28, %v2858_v15  ;;  %v416_v36 = vrot.slane %v2465_v28, %v2862_v17  ;;  %v427_v38 = vrot.slane %v2466_v37, %v2836_v3  ;;  %vm1242_vm12 = vcmask 195584  }
  0x4a   : > { %v438_v39 = vrot.slane %v2466_v37, %v2833_v2  ;;  %v449_v40 = vrot.slane %v2466_v37, %v2842_v7  ;;  %v460_v41 = vrot.slane %v2466_v37, %v2846_v9  ;;  %v471_v42 = vrot.slane %v2466_v37, %v2850_v11 }
  0x4b   : > { %v482_v43 = vrot.slane %v2466_v37, %v2854_v13  ;;  %v493_v46 = vrot.slane %v2466_v37, %v2858_v15  ;;  %v504_v49 = vrot.slane %v2466_v37, %v2862_v17  ;;  %vm1248_vm13 = vcmask 228352  }
  0x4c   : > { %vm1245_vm14 = vcmask 211968   ;;  %vm1251_vm15 = vcmask 244736  }
  0x4d   : > { %191 = vbcast.lane.b32.xlu1 %v185_v8, 264  ;;  %187 = vbcast.lane.b32.xlu0 %v185_v8, 256 }
  0x51   : > { %202 = vbcast.lane.b32.xlu1 %v196_v10, 264  ;;  %198 = vbcast.lane.b32.xlu0 %v196_v10, 256 }
  0x55   : > { %213 = vbcast.lane.b32.xlu1 %v207_v12, 264  ;;  %209 = vbcast.lane.b32.xlu0 %v207_v12, 256 }
  0x59   : > { %224 = vbcast.lane.b32.xlu1 %v218_v14, 264  ;;  %220 = vbcast.lane.b32.xlu0 %v218_v14, 256 }
  0x5d   : > { %235 = vbcast.lane.b32.xlu1 %v229_v16, 264  ;;  %231 = vbcast.lane.b32.xlu0 %v229_v16, 256 }
  0x61   : > { %246 = vbcast.lane.b32.xlu1 %v240_v18, 264  ;;  %242 = vbcast.lane.b32.xlu0 %v240_v18, 256 }
  0x65   : > { %257 = vbcast.lane.b32.xlu1 %v251_v20, 264  ;;  %253 = vbcast.lane.b32.xlu0 %v251_v20, 256 }
  0x69   : > { %268 = vbcast.lane.b32.xlu1 %v262_v21, 264  ;;  %264 = vbcast.lane.b32.xlu0 %v262_v21, 256 }
  0x6d   : > { %279 = vbcast.lane.b32.xlu1 %v273_v22, 264  ;;  %275 = vbcast.lane.b32.xlu0 %v273_v22, 256 }
  0x71   : > { %290 = vbcast.lane.b32.xlu1 %v284_v23, 264  ;;  %286 = vbcast.lane.b32.xlu0 %v284_v23, 256 }
  0x75   : > { %301 = vbcast.lane.b32.xlu1 %v295_v24, 264  ;;  %297 = vbcast.lane.b32.xlu0 %v295_v24, 256 }
  0x79   : > { %312 = vbcast.lane.b32.xlu1 %v306_v25, 264  ;;  %308 = vbcast.lane.b32.xlu0 %v306_v25, 256  ;;  %v2678_v25 = vmov 1983009808  }
  0x7d   : > { %323 = vbcast.lane.b32.xlu1 %v317_v26, 264  ;;  %319 = vbcast.lane.b32.xlu0 %v317_v26, 256  ;;  %v548_v26 = vunpack.c.l.s4 %v2678_v25 }
  0x81   : > { %334 = vbcast.lane.b32.xlu1 %v328_v27, 264  ;;  %330 = vbcast.lane.b32.xlu0 %v328_v27, 256 }
  0x85   : > { %345 = vbcast.lane.b32.xlu1 %v339_v29, 264  ;;  %341 = vbcast.lane.b32.xlu0 %v339_v29, 256  ;;  %v549_v29 = vunpack.c.0.s8 %v548_v26 }
  0x89   : > { %356 = vbcast.lane.b32.xlu1 %v350_v30, 264  ;;  %352 = vbcast.lane.b32.xlu0 %v350_v30, 256 }
  0x8d   : > { %367 = vbcast.lane.b32.xlu1 %v361_v31, 264  ;;  %363 = vbcast.lane.b32.xlu0 %v361_v31, 256 }
  0x91   : > { %378 = vbcast.lane.b32.xlu1 %v372_v32, 264  ;;  %374 = vbcast.lane.b32.xlu0 %v372_v32, 256 }
  0x95   : > { %389 = vbcast.lane.b32.xlu1 %v383_v33, 264  ;;  %385 = vbcast.lane.b32.xlu0 %v383_v33, 256 }
  0x99   : > { %400 = vbcast.lane.b32.xlu1 %v394_v34, 264  ;;  %396 = vbcast.lane.b32.xlu0 %v394_v34, 256  ;;  %v2947_v34 = vsub.s32 %v549_v29, %v2830_v1 }
  0x9d   : > { %411 = vbcast.lane.b32.xlu1 %v405_v35, 264  ;;  %407 = vbcast.lane.b32.xlu0 %v405_v35, 256 }
  0xa1   : > { %422 = vbcast.lane.b32.xlu1 %v416_v36, 264  ;;  %418 = vbcast.lane.b32.xlu0 %v416_v36, 256 }
  0xa5   : > { %433 = vbcast.lane.b32.xlu1 %v427_v38, 264  ;;  %429 = vbcast.lane.b32.xlu0 %v427_v38, 256 }
  0xa9   : > { %444 = vbcast.lane.b32.xlu1 %v438_v39, 264  ;;  %440 = vbcast.lane.b32.xlu0 %v438_v39, 256 }
  0xad   : > { %455 = vbcast.lane.b32.xlu1 %v449_v40, 264  ;;  %451 = vbcast.lane.b32.xlu0 %v449_v40, 256 }
  0xb1   : > { %466 = vbcast.lane.b32.xlu1 %v460_v41, 264  ;;  %462 = vbcast.lane.b32.xlu0 %v460_v41, 256 }
  0xb5   : > { %477 = vbcast.lane.b32.xlu1 %v471_v42, 264  ;;  %473 = vbcast.lane.b32.xlu0 %v471_v42, 256 }
  0xb7   : > { %v2890_v44 = vpop.permute.xlu1 %176  ;;  %v2892_v45 = vpop.permute.xlu0 %165 }
  0xb9   : > { %488 = vbcast.lane.b32.xlu1 %v482_v43, 264  ;;  %484 = vbcast.lane.b32.xlu0 %v482_v43, 256 }
  0xbb   : > { %v181_v47 = vpop.permute.xlu1 %180  ;;  %v170_v48 = vpop.permute.xlu0 %169 }
  0xbd   : > { %499 = vbcast.lane.b32.xlu1 %v493_v46, 264  ;;  %495 = vbcast.lane.b32.xlu0 %v493_v46, 256 }
  0xbf   : > { %v192_v50 = vpop.permute.xlu1 %191  ;;  %v188_v51 = vpop.permute.xlu0 %187 }
  0xc1   : > { %510 = vbcast.lane.b32.xlu1 %v504_v49, 264  ;;  %506 = vbcast.lane.b32.xlu0 %v504_v49, 256 }
  0xc3   : > { %v203_v52 = vpop.permute.xlu1 %202  ;;  %v199_v53 = vpop.permute.xlu0 %198 }
  0xc7   : > { %v2896_v54 = vpop.permute.xlu1 %213  ;;  %v2898_v55 = vpop.permute.xlu0 %209 }
  0xcb   : > { %v2900_v56 = vpop.permute.xlu1 %224  ;;  %v2902_v57 = vpop.permute.xlu0 %220 }
  0xcf   : > { %v236_v58 = vpop.permute.xlu1 %235  ;;  %v232_v59 = vpop.permute.xlu0 %231 }
  0xd3   : > { %v2904_v60 = vpop.permute.xlu1 %246  ;;  %v2906_v61 = vpop.permute.xlu0 %242 }
  0xd7   : > { %v2908_v62 = vpop.permute.xlu1 %257  ;;  %v2910_v63 = vpop.permute.xlu0 %253 }
  0xdb   : > { %v2912_v0 = vpop.permute.xlu1 %268  ;;  %v2914_v4 = vpop.permute.xlu0 %264 }
  0xdf   : > { %v2916_v5 = vpop.permute.xlu1 %279  ;;  %v2918_v6 = vpop.permute.xlu0 %275 }
  0xe3   : > { %v2920_v8 = vpop.permute.xlu1 %290  ;;  %v2922_v10 = vpop.permute.xlu0 %286 }
  0xe7   : > { %v2924_v12 = vpop.permute.xlu1 %301  ;;  %v2926_v14 = vpop.permute.xlu0 %297 }
  0xeb   : > { %v2928_v16 = vpop.permute.xlu1 %312  ;;  %v2930_v18 = vpop.permute.xlu0 %308 }
  0xef   : > { %v2932_v19 = vpop.permute.xlu1 %323  ;;  %v2934_v20 = vpop.permute.xlu0 %319 }
  0xf3   : > { %v2936_v21 = vpop.permute.xlu1 %334  ;;  %v2938_v22 = vpop.permute.xlu0 %330 }
  0xf7   : > { %v346_v23 = vpop.permute.xlu1 %345  ;;  %v342_v24 = vpop.permute.xlu0 %341 }
  0xf8   : > { %v2944_v33 = vsel %vm512_vm0, %v170_v48, %v346_v23 }
  0xfb   : > { %v357_v27 = vpop.permute.xlu1 %356  ;;  %v353_v28 = vpop.permute.xlu0 %352 }
  0xfc   : > { %v2952_v38 = vsel %vm512_vm0, %v181_v47, %v357_v27  ;;  %v515_v25 = vsel %vm512_vm0, %v2890_v44, %v353_v28 }
  0xff   : > { %v368_v30 = vpop.permute.xlu1 %367  ;;  %v364_v31 = vpop.permute.xlu0 %363 }
 0x100   : > { %v2941_v32 = vsel %vm512_vm0, %v192_v50, %v368_v30  ;;  %v517_v26 = vsel %vm512_vm0, %v188_v51, %v364_v31 }
 0x101   : > { %v818_v35 = vcombine.high %v2944_v33, %v2941_v32 }
 0x103   : > { %v379_v36 = vpop.permute.xlu1 %378  ;;  %v375_v37 = vpop.permute.xlu0 %374  ;;  %v2960_v41 = vrot.slane %v818_v35, %v2947_v34 }
 0x104   : > { %v2955_v39 = vsel %vm512_vm0, %v203_v52, %v379_v36  ;;  %v519_v50 = vsel %vm512_vm0, %v199_v53, %v375_v37  ;;  %v2679_v52 = vmov 1934713408   ;;  %v513_v36 = vsel %vm512_vm0, %v2892_v45, %v342_v24 }
 0x105   : > { %v834_v40 = vcombine.high %v2952_v38, %v2955_v39  ;;  %v612_v23 = vunpack.c.l.s4 %v2679_v52  ;;  %v561_v27 = vcombine.low %v515_v25, %v519_v50  ;;  %v545_v53 = vcombine.low %v513_v36, %v517_v26 }
 0x107   : > { %v2963_v42 = vrot.slane %v834_v40, %v2947_v34  ;;  %v390_v43 = vpop.permute.xlu1 %389  ;;  %v386_v46 = vpop.permute.xlu0 %385  ;;  %v613_v48 = vunpack.c.0.s8 %v612_v23  ;;  %v569_v44 = vrot.slane %v561_v27, %v2947_v34 }
 0x108   : > { %v2979_v37 = vsel %vm512_vm0, %v2896_v54, %v390_v43  ;;  %v521_v51 = vsel %vm512_vm0, %v2898_v55, %v386_v46  ;;  %v553_v46 = vrot.slane %v545_v53, %v2947_v34 }
 0x109   : > { %v3011_v23 = vsub.s32 %v613_v48, %v2830_v1  ;;  %v546_v48 = vcombine.high %v513_v36, %v517_v26 }
 0x10a   : > { %v610_v17 = vcombine.high %v553_v46, %v569_v44 }
 0x10b   : > { %v401_v49 = vpop.permute.xlu1 %400  ;;  %v397_v47 = vpop.permute.xlu0 %396  ;;  %v560_v36 = vrot.slane %v546_v48, %v2947_v34 }
 0x10c   : > { %v523_v28 = vsel %vm512_vm0, %v2902_v57, %v397_v47  ;;  %v624_v26 = vrot.slane %v610_v17, %v3011_v23  ;;  %v3890_v17 = vcombine.high %v2960_v41, %v2963_v42 }
 0x10f   : > { %v412_v29 = vpop.permute.xlu1 %411  ;;  %v408_v30 = vpop.permute.xlu0 %407 }
 0x110   : > { %v2972_v35 = vsel %vm512_vm0, %v236_v58, %v412_v29  ;;  %v525_v40 = vsel %vm512_vm0, %v232_v59, %v408_v30  ;;  %v2986_v58 = vsel %vm512_vm0, %v2900_v56, %v401_v49 }
 0x111   : > { %v850_v45 = vcombine.high %v2979_v37, %v2972_v35  ;;  %v577_v31 = vcombine.low %v521_v51, %v525_v40 }
 0x113   : > { %v423_v24 = vpop.permute.xlu1 %422  ;;  %v419_v59 = vpop.permute.xlu0 %418  ;;  %v3002_v49 = vrot.slane %v850_v45, %v2947_v34  ;;  %v585_v27 = vrot.slane %v577_v31, %v2947_v34 }
 0x114   : > { %v2994_v54 = vsel %vm512_vm0, %v2904_v60, %v423_v24  ;;  %v527_v55 = vsel %vm512_vm0, %v2906_v61, %v419_v59  ;;  %v609_v61 = vcombine.low %v553_v46, %v569_v44  ;;  %v562_v24 = vcombine.high %v515_v25, %v519_v50 }
 0x115   : > { %v866_v56 = vcombine.high %v2986_v58, %v2994_v54  ;;  %v593_v43 = vcombine.low %v523_v28, %v527_v55  ;;  %v594_v30 = vcombine.high %v523_v28, %v527_v55 }
 0x116   : > { %v3017_v13 = vrot.slane %v609_v61, %v3011_v23  ;;  %v576_v25 = vrot.slane %v562_v24, %v2947_v34 }
 0x117   : > { %v3005_v52 = vrot.slane %v866_v56, %v2947_v34  ;;  %v601_v57 = vrot.slane %v593_v43, %v2947_v34  ;;  %v434_v47 = vpop.permute.xlu1 %433  ;;  %v3008_v60 = vpop.permute.xlu0 %429  ;;  %v578_v43 = vcombine.high %v521_v51, %v525_v40  ;;  %v608_v31 = vrot.slane %v594_v30, %v2947_v34 }
 0x118   : > { %v3037_v51 = vsel %vm512_vm0, %v2908_v62, %v434_v47  ;;  %v625_v62 = vcombine.low %v560_v36, %v576_v25  ;;  %v626_v48 = vcombine.high %v560_v36, %v576_v25 }
 0x119   : > { %v930_v29 = vcombine.high %v3002_v49, %v3005_v52  ;;  %v641_v53 = vcombine.low %v585_v27, %v601_v57  ;;  %v642_v45 = vcombine.high %v585_v27, %v601_v57  ;;  %v592_v40 = vrot.slane %v578_v43, %v2947_v34 }
 0x11b   : > { %v445_v59 = vpop.permute.xlu1 %444  ;;  %v441_v56 = vpop.permute.xlu0 %440  ;;  %v3020_v1 = vrot.slane %v641_v53, %v3011_v23  ;;  %v656_v28 = vrot.slane %v642_v45, %v3011_v23  ;;  %v3040_v46 = vrot.slane %v930_v29, %v3011_v23  ;;  %v657_v57 = vcombine.low %v592_v40, %v608_v31 }
 0x11c   : > { %v3050_v53 = vrot.slane %v3890_v17, %v3011_v23  ;;  %v3054_v47 = vsel %vm512_vm0, %v2912_v0, %v445_v59 }
 0x11d   : > { %v674_v9 = vcombine.high %v3017_v13, %v3020_v1  ;;  %v675_v61 = vcombine.low %v624_v26, %v656_v28  ;;  %v676_v24 = vcombine.high %v624_v26, %v656_v28  ;;  %v665_v43 = vrot.slane %v657_v57, %v3011_v23 }
 0x11e   : > { %v633_v28 = vrot.slane %v625_v62, %v3011_v23  ;;  %v833_v26 = vcombine.low %v2952_v38, %v2955_v39  ;;  %v849_v62 = vcombine.low %v2979_v37, %v2972_v35 }
 0x11f   : > { %v456_v55 = vpop.permute.xlu1 %455  ;;  %v452_v50 = vpop.permute.xlu0 %451  ;;  %1091 = vrot.lane.b32.xlu0 %v674_v9, %s2680_s18 }
 0x120   : > { %v3030_v44 = vsel %vm512_vm0, %v2916_v5, %v456_v55  ;;  %v677_v17 = vcombine.low %v633_v28, %v665_v43  ;;  %v3092_v39 = vrot.slane %v833_v26, %v2947_v34 }
 0x121   : > { %v954_v27 = vcombine.high %v3037_v51, %v3030_v44 }
 0x123   : > { %v467_v9 = vpop.permute.xlu1 %466  ;;  %v463_v30 = vpop.permute.xlu0 %462  ;;  %1099 = vrot.lane.b32.xlu0 %v675_v61, %s2681_s27  ;;  %v3069_v59 = vrot.slane %v954_v27, %v2947_v34  ;;  %v865_v27 = vcombine.low %v2986_v58, %v2994_v54 }
 0x124   : > { %v3058_v29 = vsel %vm512_vm0, %v2920_v8, %v467_v9  ;;  %v658_v9 = vcombine.high %v592_v40, %v608_v31  ;;  %v3088_v38 = vsel %vm512_vm0, %v2922_v10, %v463_v30  ;;  %v3107_v10 = vsel %vm512_vm0, %v2918_v6, %v452_v50 }
 0x125   : > { %v970_v45 = vcombine.high %v3054_v47, %v3058_v29  ;;  %v3095_v58 = vrot.slane %v865_v27, %v2947_v34  ;;  %v857_v40 = vrot.slane %v849_v62, %v2947_v34  ;;  %v3123_v50 = vsel %vm512_vm0, %v2910_v63, %v3008_v60 }
 0x126   : > { %v672_v35 = vrot.slane %v658_v9, %v3011_v23 }
 0x127   : > { %v3072_v8 = vrot.slane %v970_v45, %v2947_v34  ;;  %v478_v55 = vpop.permute.xlu1 %477  ;;  %v474_v61 = vpop.permute.xlu0 %473  ;;  %1107 = vrot.lane.b32.xlu0 %v676_v24, %s2682_s29  ;;  %v817_v45 = vcombine.low %v2944_v33, %v2941_v32  ;;  %v3099_v32 = vsel %vm512_vm0, %v2914_v4, %v441_v56  ;;  %v678_v33 = vcombine.high %v633_v28, %v665_v43 }
 0x128   : > { %v697_v54 = vcombine.low %v3099_v32, %v3088_v38  ;;  %v640_v56 = vrot.slane %v626_v48, %v3011_v23  ;;  %v913_v30 = vcombine.low %v857_v40, %v3095_v58  ;;  %v3132_v24 = vsel %vm512_vm0, %v2924_v12, %v478_v55 }
 0x129   : > { %v1034_v57 = vcombine.high %v3069_v59, %v3072_v8  ;;  %v3103_v37 = vrot.slane %v817_v45, %v2947_v34  ;;  %v537_v28 = vsel %vm512_vm0, %v2926_v14, %v474_v61 }
 0x12a   : > { %v679_v43 = vcombine.low %v640_v56, %v672_v35  ;;  %v705_v48 = vrot.slane %v697_v54, %v2947_v34  ;;  %v680_v9 = vcombine.high %v640_v56, %v672_v35 }
 0x12b   : > { %v489_v5 = vpop.permute.xlu1 %488  ;;  %v485_v0 = vpop.permute.xlu0 %484  ;;  %1115 = vrot.lane.b32.xlu0 %v677_v17, %s2683_s30  ;;  %v881_v6 = vcombine.low %v3103_v37, %v3092_v39 }
 0x12c   : > { %v3139_v63 = vsel %vm512_vm0, %v2928_v16, %v489_v5  ;;  %v539_v27 = vsel %vm512_vm0, %v2930_v18, %v485_v0  ;;  %v921_v18 = vrot.slane %v913_v30, %v3011_v23  ;;  %v882_v30 = vcombine.high %v3103_v37, %v3092_v39 }
 0x12d   : > { %v889_v62 = vrot.slane %v881_v6, %v3011_v23 }
 0x12f   : > { %v500_v31 = vpop.permute.xlu1 %499  ;;  %v496_v25 = vpop.permute.xlu0 %495  ;;  %1123 = vrot.lane.b32.xlu0 %v678_v33, %s2684_s2  ;;  %v914_v33 = vcombine.high %v857_v40, %v3095_v58  ;;  %v945_v56 = vcombine.low %v889_v62, %v921_v18 }
 0x130   : > { %v3114_v4 = vsel %vm512_vm0, %v2932_v19, %v500_v31  ;;  %v541_v36 = vsel %vm512_vm0, %v2934_v20, %v496_v25  ;;  %v681_v19 = vcombine.low %v3123_v50, %v3107_v10 }
 0x131   : > { %v986_v20 = vcombine.high %v3132_v24, %v3114_v4  ;;  %v713_v12 = vcombine.low %v537_v28, %v541_v36  ;;  %v928_v39 = vrot.slane %v914_v33, %v3011_v23 }
 0x132   : > { %v689_v61 = vrot.slane %v681_v19, %v2947_v34  ;;  %v698_v19 = vcombine.high %v3099_v32, %v3088_v38  ;;  %v682_v38 = vcombine.high %v3123_v50, %v3107_v10 }
 0x133   : > { %v511_v60 = vpop.permute.xlu1 %510  ;;  %v507_v26 = vpop.permute.xlu0 %506  ;;  %1131 = vrot.lane.b32.xlu0 %v679_v43, %s2685_s5  ;;  %v3157_v0 = vrot.slane %v986_v20, %v2947_v34  ;;  %v714_v20 = vcombine.high %v537_v28, %v541_v36 }
 0x134   : > { %v3147_v55 = vsel %vm512_vm0, %v2936_v21, %v511_v60  ;;  %v543_v14 = vsel %vm512_vm0, %v2938_v22, %v507_v26  ;;  %v745_v45 = vcombine.low %v689_v61, %v705_v48  ;;  %v721_v22 = vrot.slane %v713_v12, %v2947_v34 }
 0x135   : > { %v1002_v16 = vcombine.high %v3139_v63, %v3147_v55  ;;  %v729_v5 = vcombine.low %v539_v27, %v543_v14  ;;  %v730_v54 = vcombine.high %v539_v27, %v543_v14  ;;  %v746_v43 = vcombine.high %v689_v61, %v705_v48 }
 0x136   : > { %v3175_v58 = vrot.slane %v745_v45, %v3011_v23  ;;  %v946_v60 = vcombine.high %v889_v62, %v921_v18  ;;  %v3194_v48 = vrot.slane %v1034_v57, %v3011_v23  ;;  %v712_v28 = vrot.slane %v698_v19, %v2947_v34 }
 0x137   : > { %v3160_v21 = vrot.slane %v1002_v16, %v2947_v34  ;;  %v737_v17 = vrot.slane %v729_v5, %v2947_v34  ;;  %1139 = vrot.lane.b32.xlu0 %v680_v9, %s2686_s12  ;;  %v744_v32 = vrot.slane %v730_v54, %v2947_v34  ;;  %v896_v26 = vrot.slane %v882_v30, %v3011_v23  ;;  %v3230_v30 = vld [vmem:[%s2824_s4 + $0x20] sm:$0xff] }
 0x138   : > { %3891 = vst [vmem:[#allocation11_spill] sm:$0xff] %v3175_v58  ;;  %v728_v27 = vrot.slane %v714_v20, %v2947_v34  ;;  %v760_v10 = vrot.slane %v746_v43, %v3011_v23  ;;  %v929_v57 = vcombine.low %v3002_v49, %v3005_v52  ;;  %v696_v16 = vrot.slane %v682_v38, %v2947_v34 }
 0x139   : > { %v1066_v35 = vcombine.high %v3157_v0, %v3160_v21  ;;  %v777_v31 = vcombine.low %v721_v22, %v737_v17  ;;  %v778_v25 = vcombine.high %v721_v22, %v737_v17  ;;  %v947_v61 = vcombine.low %v896_v26, %v928_v39 }
 0x13a   : > { %v793_v5 = vcombine.low %v728_v27, %v744_v32  ;;  %v897_v18 = vcombine.low %v2960_v41, %v2963_v42  ;;  %v761_v17 = vcombine.low %v696_v16, %v712_v28  ;;  %v948_v49 = vcombine.high %v896_v26, %v928_v39 }
 0x13b   : > { %1147 = vrot.lane.b32.xlu0 %v945_v56, %s2687_s13  ;;  %v3178_v40 = vrot.slane %v777_v31, %v3011_v23  ;;  %v3181_v6 = vrot.slane %v1066_v35, %v3011_v23  ;;  %v792_v36 = vrot.slane %v778_v25, %v3011_v23  ;;  %v937_v45 = vrot.slane %v929_v57, %v3011_v23 }
 0x13c   : > { %v801_v22 = vrot.slane %v793_v5, %v3011_v23  ;;  %v905_v41 = vrot.slane %v897_v18, %v3011_v23  ;;  %v769_v42 = vrot.slane %v761_v17, %v3011_v23  ;;  %v1001_v62 = vcombine.low %v3139_v63, %v3147_v55 }
 0x13d   : > { %3892 = vst [vmem:[#allocation12_spill] sm:$0xff] %v3178_v40  ;;  %v810_v37 = vcombine.high %v3175_v58, %v3178_v40  ;;  %v811_v9 = vcombine.low %v760_v10, %v792_v36  ;;  %v812_v52 = vcombine.high %v760_v10, %v792_v36  ;;  %v794_v33 = vcombine.high %v728_v27, %v744_v32 }
 0x13e   : > { %v949_v35 = vcombine.low %v905_v41, %v937_v45  ;;  %v813_v54 = vcombine.low %v769_v42, %v801_v22  ;;  %v969_v31 = vcombine.low %v3054_v47, %v3058_v29  ;;  %v762_v25 = vcombine.high %v696_v16, %v712_v28  ;;  %v2468_v16 = vld [vmem:[%s2824_s4 + $0x28] sm:$0xff] }
 0x13f   : > { %1155 = vrot.lane.b32.xlu0 %v946_v60, %s2688_s15  ;;  %1093 = vrot.lane.b32.xlu1 %v810_v37, %s2680_s18  ;;  %v985_v56 = vcombine.low %v3132_v24, %v3114_v4  ;;  %v953_v63 = vcombine.low %v3037_v51, %v3030_v44  ;;  %v1009_v55 = vrot.slane %v1001_v62, %v2947_v34 }
 0x140   : > { %v950_v19 = vcombine.high %v905_v41, %v937_v45  ;;  %v814_v43 = vcombine.high %v769_v42, %v801_v22  ;;  %v808_v47 = vrot.slane %v794_v33, %v3011_v23  ;;  %v3238_v29 = vrot.slane %v3230_v30, %v2836_v3  ;;  %v2469_v42 = vld [vmem:[%s2824_s4 + $0x30] sm:$0xff] }
 0x141   : > { %v977_v4 = vrot.slane %v969_v31, %v2947_v34  ;;  %v993_v24 = vrot.slane %v985_v56, %v2947_v34  ;;  %v776_v44 = vrot.slane %v762_v25, %v3011_v23  ;;  %v961_v51 = vrot.slane %v953_v63, %v2947_v34  ;;  %v3893_v31 = vld [vmem:[#allocation8_spill] sm:$0xff]  ;;  %v3894_v63 = vld [vmem:[#allocation9_spill] sm:$0xff] }
 0x142   : > { %v3250_v38 = vrot.slane %v3230_v30, %v2842_v7  ;;  %v3257_v36 = vrot.slane %v3230_v30, %v2850_v11  ;;  %v3264_v57 = vrot.slane %v3230_v30, %v2858_v15  ;;  %v1065_v17 = vcombine.low %v3157_v0, %v3160_v21 }
 0x143   : > { %1163 = vrot.lane.b32.xlu0 %v947_v61, %s2689_s16  ;;  %1101 = vrot.lane.b32.xlu1 %v811_v9, %s2681_s27  ;;  %v1049_v20 = vcombine.low %v993_v24, %v1009_v55  ;;  %v815_v60 = vcombine.low %v776_v44, %v808_v47  ;;  %v1017_v39 = vcombine.low %v961_v51, %v977_v4 }
 0x144   : > { %v816_v32 = vcombine.high %v776_v44, %v808_v47  ;;  %v1050_v26 = vcombine.high %v993_v24, %v1009_v55  ;;  %v1018_v10 = vcombine.high %v961_v51, %v977_v4  ;;  %v3271_v9 = vrot.slane %v2468_v16, %v2836_v3  ;;  %v2470_v4 = vld [vmem:[%s2824_s4 + $0x38] sm:$0xff]  ;;  %s3766_s4 = scalar_lea.vmem [#allocation5], %s2464_s3 }
 0x145   : > { %v1057_v37 = vrot.slane %v1049_v20, %v3011_v23  ;;  %v1025_v28 = vrot.slane %v1017_v39, %v3011_v23  ;;  %v3281_v45 = vrot.slane %v2468_v16, %v2842_v7  ;;  %v1073_v41 = vrot.slane %v1065_v17, %v3011_v23 }
 0x146   : > { %v1064_v61 = vrot.slane %v1050_v26, %v3011_v23  ;;  %v1032_v18 = vrot.slane %v1018_v10, %v3011_v23  ;;  %v3287_v0 = vrot.slane %v2468_v16, %v2850_v11  ;;  %v3299_v33 = vrot.slane %v2469_v42, %v2836_v3 }
 0x147   : > { %1171 = vrot.lane.b32.xlu0 %v948_v49, %s2690_s17  ;;  %1109 = vrot.lane.b32.xlu1 %v812_v52, %s2682_s29  ;;  %v1081_v27 = vcombine.low %v1025_v28, %v1057_v37  ;;  %v1082_v5 = vcombine.high %v1025_v28, %v1057_v37  ;;  %v1033_v52 = vcombine.low %v3069_v59, %v3072_v8 }
 0x148   : > { %v1083_v49 = vcombine.low %v1032_v18, %v1064_v61  ;;  %v1084_v22 = vcombine.high %v1032_v18, %v1064_v61  ;;  %v3293_v8 = vrot.slane %v2468_v16, %v2858_v15  ;;  %v3312_v25 = vrot.slane %v3230_v30, %v3893_v31 }
 0x149   : > { %v1041_v21 = vrot.slane %v1033_v52, %v3011_v23  ;;  %v3317_v56 = vrot.slane %v2469_v42, %v2850_v11  ;;  %v3321_v55 = vrot.slane %v3230_v30, %v3894_v63  ;;  %v3336_v24 = vrot.slane %v2470_v4, %v2836_v3 }
 0x14a   : > { %v3339_v44 = vrot.slane %v2468_v16, %v2833_v2  ;;  %v3344_v51 = vrot.slane %v2470_v4, %v2842_v7  ;;  %v3352_v3 = vrot.slane %v2470_v4, %v2850_v11  ;;  %v3355_v20 = vrot.slane %v2468_v16, %v3894_v63 }
 0x14b   : > { %1179 = vrot.lane.b32.xlu0 %v949_v35, %s2691_s22  ;;  %1117 = vrot.lane.b32.xlu1 %v813_v54, %s2683_s30  ;;  %v1085_v59 = vcombine.low %v1041_v21, %v1073_v41  ;;  %v1086_v62 = vcombine.high %v1041_v21, %v1073_v41  ;;  %v3303_v35 = vrot.slane %v3230_v30, %v2833_v2 }
 0x14c   : > { %v3308_v54 = vrot.slane %v2469_v42, %v2842_v7  ;;  %v3360_v7 = vrot.slane %v2470_v4, %v2858_v15  ;;  %v3368_v11 = vrot.slane %v2469_v42, %v2833_v2  ;;  %v3382_v37 = vrot.slane %v2469_v42, %v3894_v63 }
 0x14d   : > { %v1563_v10 = vrot.slane %v2470_v4, %v3893_v31 }
 0x14f   : > { %1187 = vrot.lane.b32.xlu0 %v950_v19, %s2692_s23  ;;  %1125 = vrot.lane.b32.xlu1 %v814_v43, %s2684_s2  ;;  %v3326_v19 = vrot.slane %v2469_v42, %v2858_v15  ;;  %v3895_v43 = vld [vmem:[#allocation10_spill] sm:$0xff] }
 0x150   : > { %v3330_v47 = vrot.slane %v3230_v30, %v3895_v43  ;;  %v3347_v30 = vrot.slane %v2468_v16, %v3893_v31 }
 0x153   : > { %1268 = vbcast.lane.b32.xlu0 %v3238_v29, 256  ;;  %1133 = vrot.lane.b32.xlu1 %v815_v60, %s2685_s5  ;;  %v3363_v60 = vrot.slane %v2468_v16, %v3895_v43 }
 0x157   : > { %1290 = vbcast.lane.b32.xlu0 %v3250_v38, 256  ;;  %1141 = vrot.lane.b32.xlu1 %v816_v32, %s2686_s12  ;;  %v3375_v32 = vrot.slane %v2469_v42, %v3893_v31 }
 0x15b   : > { %1312 = vbcast.lane.b32.xlu0 %v3257_v36, 256  ;;  %1149 = vrot.lane.b32.xlu1 %v1081_v27, %s2687_s13 }
 0x15f   : > { %1334 = vbcast.lane.b32.xlu0 %v3264_v57, 256  ;;  %1157 = vrot.lane.b32.xlu1 %v1082_v5, %s2688_s15 }
 0x163   : > { %1356 = vbcast.lane.b32.xlu0 %v3271_v9, 256  ;;  %1165 = vrot.lane.b32.xlu1 %v1083_v49, %s2689_s16 }
 0x167   : > { %1378 = vbcast.lane.b32.xlu0 %v3281_v45, 256  ;;  %1173 = vrot.lane.b32.xlu1 %v1084_v22, %s2690_s17 }
 0x16b   : > { %1400 = vbcast.lane.b32.xlu0 %v3287_v0, 256  ;;  %1181 = vrot.lane.b32.xlu1 %v1085_v59, %s2691_s22 }
 0x16f   : > { %1422 = vbcast.lane.b32.xlu0 %v3293_v8, 256  ;;  %1189 = vrot.lane.b32.xlu1 %v1086_v62, %s2692_s23 }
 0x173   : > { %1444 = vbcast.lane.b32.xlu0 %v3299_v33, 256  ;;  %1279 = vbcast.lane.b32.xlu1 %v3303_v35, 256 }
 0x177   : > { %1466 = vbcast.lane.b32.xlu0 %v3308_v54, 256  ;;  %1301 = vbcast.lane.b32.xlu1 %v3312_v25, 256 }
 0x17b   : > { %1488 = vbcast.lane.b32.xlu0 %v3317_v56, 256  ;;  %1323 = vbcast.lane.b32.xlu1 %v3321_v55, 256 }
 0x17f   : > { %1510 = vbcast.lane.b32.xlu0 %v3326_v19, 256  ;;  %1345 = vbcast.lane.b32.xlu1 %v3330_v47, 256 }
 0x183   : > { %1532 = vbcast.lane.b32.xlu0 %v3336_v24, 256  ;;  %1367 = vbcast.lane.b32.xlu1 %v3339_v44, 256 }
 0x187   : > { %1554 = vbcast.lane.b32.xlu0 %v3344_v51, 256  ;;  %1389 = vbcast.lane.b32.xlu1 %v3347_v30, 256 }
 0x18b   : > { %1576 = vbcast.lane.b32.xlu0 %v3352_v3, 256  ;;  %1411 = vbcast.lane.b32.xlu1 %v3355_v20, 256 }
 0x18f   : > { %1598 = vbcast.lane.b32.xlu0 %v3360_v7, 256  ;;  %1433 = vbcast.lane.b32.xlu1 %v3363_v60, 256 }
 0x191   : > { %v3370_v39 = vpop.permute.xlu0 %1091 }
 0x193   : > { %1272 = vbcast.lane.b32.xlu0 %v3238_v29, 264  ;;  %1455 = vbcast.lane.b32.xlu1 %v3368_v11, 256  ;;  %v1519_v29 = vrot.slane %v2469_v42, %v3895_v43 }
 0x195   : > { %v3377_v15 = vpop.permute.xlu0 %1099 }
 0x197   : > { %1294 = vbcast.lane.b32.xlu0 %v3250_v38, 264  ;;  %1477 = vbcast.lane.b32.xlu1 %v3375_v32, 256  ;;  %v1541_v38 = vrot.slane %v2470_v4, %v2833_v2  ;;  %v1607_v2 = vrot.slane %v2470_v4, %v3895_v43 }
 0x199   : > { %v3384_v28 = vpop.permute.xlu0 %1107 }
 0x19b   : > { %1316 = vbcast.lane.b32.xlu0 %v3257_v36, 264  ;;  %1499 = vbcast.lane.b32.xlu1 %v3382_v37, 256  ;;  %v1585_v36 = vrot.slane %v2470_v4, %v3894_v63 }
 0x19d   : > { %v3389_v26 = vpop.permute.xlu0 %1115 }
 0x19f   : > { %1338 = vbcast.lane.b32.xlu0 %v3264_v57, 264  ;;  %1521 = vbcast.lane.b32.xlu1 %v1519_v29, 256 }
 0x1a1   : > { %v3393_v27 = vpop.permute.xlu0 %1123 }
 0x1a3   : > { %1360 = vbcast.lane.b32.xlu0 %v3271_v9, 264  ;;  %1543 = vbcast.lane.b32.xlu1 %v1541_v38, 256 }
 0x1a5   : > { %v3397_v16 = vpop.permute.xlu0 %1131 }
 0x1a7   : > { %1382 = vbcast.lane.b32.xlu0 %v3281_v45, 264  ;;  %1565 = vbcast.lane.b32.xlu1 %v1563_v10, 256 }
 0x1a9   : > { %v3401_v5 = vpop.permute.xlu0 %1139 }
 0x1ab   : > { %1404 = vbcast.lane.b32.xlu0 %v3287_v0, 264  ;;  %1587 = vbcast.lane.b32.xlu1 %v1585_v36, 256 }
 0x1ad   : > { %v3405_v57 = vpop.permute.xlu0 %1147 }
 0x1af   : > { %1426 = vbcast.lane.b32.xlu0 %v3293_v8, 264  ;;  %1609 = vbcast.lane.b32.xlu1 %v1607_v2, 256 }
 0x1b1   : > { %v3408_v61 = vpop.permute.xlu1 %1093  ;;  %v3410_v9 = vpop.permute.xlu0 %1155 }
 0x1b2   : > { %3896 = vst [vmem:[#allocation8_spill] sm:$0xff] %v3408_v61 }
 0x1b3   : > { %1448 = vbcast.lane.b32.xlu0 %v3299_v33, 264  ;;  %1283 = vbcast.lane.b32.xlu1 %v3303_v35, 264 }
 0x1b5   : > { %v3414_v18 = vpop.permute.xlu1 %1101  ;;  %v3416_v17 = vpop.permute.xlu0 %1163 }
 0x1b6   : > { %3897 = vst [vmem:[#allocation9_spill] sm:$0xff] %v3414_v18 }
 0x1b7   : > { %1470 = vbcast.lane.b32.xlu0 %v3308_v54, 264  ;;  %1305 = vbcast.lane.b32.xlu1 %v3312_v25, 264 }
 0x1b9   : > { %v3420_v49 = vpop.permute.xlu1 %1109  ;;  %v3422_v52 = vpop.permute.xlu0 %1171 }
 0x1ba   : > { %3898 = vst [vmem:[#allocation10_spill] sm:$0xff] %v3420_v49 }
 0x1bb   : > { %1492 = vbcast.lane.b32.xlu0 %v3317_v56, 264  ;;  %1327 = vbcast.lane.b32.xlu1 %v3321_v55, 264 }
 0x1bd   : > { %v3426_v45 = vpop.permute.xlu1 %1117  ;;  %v3428_v22 = vpop.permute.xlu0 %1179 }
 0x1be   : > { %3899 = vst [vmem:[#allocation13_spill] sm:$0xff] %v3426_v45 }
 0x1bf   : > { %1514 = vbcast.lane.b32.xlu0 %v3326_v19, 264  ;;  %1349 = vbcast.lane.b32.xlu1 %v3330_v47, 264 }
 0x1c1   : > { %v3432_v41 = vpop.permute.xlu1 %1125  ;;  %v3434_v0 = vpop.permute.xlu0 %1187 }
 0x1c2   : > { %3900 = vst [vmem:[#allocation14_spill] sm:$0xff] %v3432_v41 }
 0x1c3   : > { %1536 = vbcast.lane.b32.xlu0 %v3336_v24, 264  ;;  %1371 = vbcast.lane.b32.xlu1 %v3339_v44, 264 }
 0x1c5   : > { %v3438_v21 = vpop.permute.xlu1 %1133  ;;  %v1269_v59 = vpop.permute.xlu0 %1268 }
 0x1c6   : > { %3901 = vst [vmem:[#allocation15_spill] sm:$0xff] %v3438_v21 }
 0x1c7   : > { %1558 = vbcast.lane.b32.xlu0 %v3344_v51, 264  ;;  %1393 = vbcast.lane.b32.xlu1 %v3347_v30, 264 }
 0x1c9   : > { %v3442_v8 = vpop.permute.xlu1 %1141  ;;  %v1291_v42 = vpop.permute.xlu0 %1290 }
 0x1ca   : > { %3902 = vst [vmem:[#allocation16_spill] sm:$0xff] %v3442_v8 }
 0x1cb   : > { %1580 = vbcast.lane.b32.xlu0 %v3352_v3, 264  ;;  %1415 = vbcast.lane.b32.xlu1 %v3355_v20, 264 }
 0x1cd   : > { %v3446_v62 = vpop.permute.xlu1 %1149  ;;  %v1313_v33 = vpop.permute.xlu0 %1312 }
 0x1ce   : > { %3903 = vst [vmem:[#allocation17_spill] sm:$0xff] %v3446_v62 }
 0x1cf   : > { %1602 = vbcast.lane.b32.xlu0 %v3360_v7, 264  ;;  %1437 = vbcast.lane.b32.xlu1 %v3363_v60, 264 }
 0x1d1   : > { %v3450_v35 = vpop.permute.xlu1 %1157  ;;  %v1335_v54 = vpop.permute.xlu0 %1334 }
 0x1d2   : > { %3904 = vst [vmem:[#allocation18_spill] sm:$0xff] %v3450_v35 }
 0x1d3   : > { %1459 = vbcast.lane.b32.xlu1 %v3368_v11, 264 }
 0x1d5   : > { %v3453_v31 = vpop.permute.xlu1 %1165  ;;  %v3455_v25 = vpop.permute.xlu0 %1356 }
 0x1d6   : > { %3905 = vst [vmem:[#allocation19_spill] sm:$0xff] %v3453_v31 }
 0x1d7   : > { %1481 = vbcast.lane.b32.xlu1 %v3375_v32, 264 }
 0x1d9   : > { %v3458_v56 = vpop.permute.xlu1 %1173  ;;  %v3460_v63 = vpop.permute.xlu0 %1378 }
 0x1da   : > { %3906 = vst [vmem:[#allocation20_spill] sm:$0xff] %v3458_v56 }
 0x1db   : > { %1503 = vbcast.lane.b32.xlu1 %v3382_v37, 264 }
 0x1dd   : > { %v3463_v55 = vpop.permute.xlu1 %1181  ;;  %v3465_v19 = vpop.permute.xlu0 %1400 }
 0x1de   : > { %3907 = vst [vmem:[#allocation21_spill] sm:$0xff] %v3463_v55 }
 0x1df   : > { %1525 = vbcast.lane.b32.xlu1 %v1519_v29, 264 }
 0x1e1   : > { %v3467_v43 = vpop.permute.xlu1 %1189  ;;  %v3469_v47 = vpop.permute.xlu0 %1422 }
 0x1e2   : > { %3908 = vst [vmem:[#allocation22_spill] sm:$0xff] %v3467_v43 }
 0x1e3   : > { %1547 = vbcast.lane.b32.xlu1 %v1541_v38, 264 }
 0x1e5   : > { %v1280_v4 = vpop.permute.xlu1 %1279  ;;  %v1445_v24 = vpop.permute.xlu0 %1444 }
 0x1e6   : > { %v1615_v8 = vsel %vm512_vm0, %v1269_v59, %v1445_v24 }
 0x1e7   : > { %1569 = vbcast.lane.b32.xlu1 %v1563_v10, 264 }
 0x1e9   : > { %v1302_v44 = vpop.permute.xlu1 %1301  ;;  %v1467_v51 = vpop.permute.xlu0 %1466 }
 0x1ea   : > { %v1619_v55 = vsel %vm512_vm0, %v1291_v42, %v1467_v51 }
 0x1eb   : > { %1591 = vbcast.lane.b32.xlu1 %v1585_v36, 264  ;;  %v1647_v41 = vcombine.low %v1615_v8, %v1619_v55 }
 0x1ed   : > { %v1324_v30 = vpop.permute.xlu1 %1323  ;;  %v1489_v3 = vpop.permute.xlu0 %1488 }
 0x1ee   : > { %v1623_v45 = vsel %vm512_vm0, %v1313_v33, %v1489_v3 }
 0x1ef   : > { %1613 = vbcast.lane.b32.xlu1 %v1607_v2, 264 }
 0x1f1   : > { %v1346_v20 = vpop.permute.xlu1 %1345  ;;  %v1511_v7 = vpop.permute.xlu0 %1510 }
 0x1f2   : > { %v1627_v21 = vsel %vm512_vm0, %v1335_v54, %v1511_v7 }
 0x1f3   : > { %v1679_v49 = vcombine.low %v1623_v45, %v1627_v21 }
 0x1f5   : > { %v1368_v60 = vpop.permute.xlu1 %1367  ;;  %v1533_v11 = vpop.permute.xlu0 %1532  ;;  %v1687_v59 = vrot.slane %v1679_v49, %v2947_v34 }
 0x1f9   : > { %v1390_v32 = vpop.permute.xlu1 %1389  ;;  %v1555_v37 = vpop.permute.xlu0 %1554 }
 0x1fd   : > { %v3471_v29 = vpop.permute.xlu1 %1411  ;;  %v1577_v50 = vpop.permute.xlu0 %1576 }
 0x201   : > { %v3473_v14 = vpop.permute.xlu1 %1433  ;;  %v1599_v38 = vpop.permute.xlu0 %1598 }
 0x205   : > { %v1456_v12 = vpop.permute.xlu1 %1455  ;;  %v3475_v10 = vpop.permute.xlu0 %1272 }
 0x206   : > { %v1617_v56 = vsel %vm512_vm0, %v1280_v4, %v1456_v12  ;;  %v1655_v12 = vrot.slane %v1647_v41, %v2947_v34 }
 0x209   : > { %v1478_v43 = vpop.permute.xlu1 %1477  ;;  %v3477_v36 = vpop.permute.xlu0 %1294 }
 0x20a   : > { %v1621_v2 = vsel %vm512_vm0, %v1302_v44, %v1478_v43 }
 0x20b   : > { %v1663_v31 = vcombine.low %v1617_v56, %v1621_v2  ;;  %v1664_v58 = vcombine.high %v1617_v56, %v1621_v2 }
 0x20d   : > { %v1500_v35 = vpop.permute.xlu1 %1499  ;;  %v3482_v62 = vpop.permute.xlu0 %1316  ;;  %v1671_v18 = vrot.slane %v1663_v31, %v2947_v34  ;;  %v1680_v31 = vcombine.high %v1623_v45, %v1627_v21  ;;  %v3513_v21 = vsel %vm512_vm0, %v3460_v63, %v1555_v37  ;;  %v1678_v2 = vrot.slane %v1664_v58, %v2947_v34 }
 0x20e   : > { %v1625_v43 = vsel %vm512_vm0, %v1324_v30, %v1500_v35  ;;  %v1643_v63 = vsel %vm512_vm0, %v3469_v47, %v1599_v38 }
 0x20f   : > { %v1711_v24 = vcombine.low %v1655_v12, %v1671_v18  ;;  %v1712_v61 = vcombine.high %v1655_v12, %v1671_v18  ;;  %v1694_v45 = vrot.slane %v1680_v31, %v2947_v34 }
 0x211   : > { %v1522_v40 = vpop.permute.xlu1 %1521  ;;  %v3491_v44 = vpop.permute.xlu0 %1338  ;;  %v3496_v35 = vrot.slane %v1711_v24, %v3011_v23  ;;  %v1639_v24 = vsel %vm512_vm0, %v3465_v19, %v1577_v50 }
 0x212   : > { %v1629_v42 = vsel %vm512_vm0, %v1346_v20, %v1522_v40  ;;  %v1648_v20 = vcombine.high %v1615_v8, %v1619_v55 }
 0x213   : > { %v1695_v4 = vcombine.low %v1625_v43, %v1629_v42  ;;  %v1696_v33 = vcombine.high %v1625_v43, %v1629_v42 }
 0x215   : > { %v1703_v54 = vrot.slane %v1695_v4, %v2947_v34  ;;  %v1544_v51 = vpop.permute.xlu1 %1543  ;;  %v3501_v41 = vpop.permute.xlu0 %1360  ;;  %v1710_v43 = vrot.slane %v1696_v33, %v2947_v34  ;;  %v1631_v4 = vsel %vm512_vm0, %v3455_v25, %v1533_v11 }
 0x216   : > { %v1633_v56 = vsel %vm512_vm0, %v1368_v60, %v1544_v51  ;;  %v1662_v60 = vrot.slane %v1648_v20, %v2947_v34  ;;  %v1783_v58 = vcombine.low %v1631_v4, %v3513_v21 }
 0x217   : > { %v1743_v3 = vcombine.low %v1687_v59, %v1703_v54  ;;  %v1744_v7 = vcombine.high %v1687_v59, %v1703_v54  ;;  %v1759_v37 = vcombine.low %v1694_v45, %v1710_v43  ;;  %v1815_v54 = vcombine.low %v1639_v24, %v1643_v63 }
 0x218   : > { %v1727_v51 = vcombine.low %v1662_v60, %v1678_v2  ;;  %v1791_v11 = vrot.slane %v1783_v58, %v2947_v34 }
 0x219   : > { %v3499_v40 = vrot.slane %v1743_v3, %v3011_v23  ;;  %v1566_v30 = vpop.permute.xlu1 %1565  ;;  %v1758_v42 = vrot.slane %v1744_v7, %v3011_v23  ;;  %v1767_v38 = vrot.slane %v1759_v37, %v3011_v23  ;;  %v1823_v50 = vrot.slane %v1815_v54, %v2947_v34 }
 0x21a   : > { %v3504_v49 = vsel %vm512_vm0, %v1390_v32, %v1566_v30  ;;  %v1726_v32 = vrot.slane %v1712_v61, %v3011_v23  ;;  %v3528_v61 = vpop.permute.xlu0 %1382  ;;  %v1735_v19 = vrot.slane %v1727_v51, %v3011_v23 }
 0x21b   : > { %v1776_v18 = vcombine.high %v3496_v35, %v3499_v40  ;;  %v1799_v8 = vcombine.low %v1633_v56, %v3504_v49 }
 0x21c   : > { %v1777_v59 = vcombine.low %v1726_v32, %v1758_v42  ;;  %v1778_v31 = vcombine.high %v1726_v32, %v1758_v42  ;;  %v1779_v37 = vcombine.low %v1735_v19, %v1767_v38  ;;  %v1728_v42 = vcombine.high %v1662_v60, %v1678_v2 }
 0x21d   : > { %v1588_v55 = vpop.permute.xlu1 %1587  ;;  %2193 = vrot.lane.b32.xlu0 %v1776_v18, %s2680_s18  ;;  %v1807_v33 = vrot.slane %v1799_v8, %v2947_v34  ;;  %v1800_v32 = vcombine.high %v1633_v56, %v3504_v49  ;;  %v1780_v49 = vcombine.high %v1735_v19, %v1767_v38 }
 0x21e   : > { %v1641_v25 = vsel %vm512_vm0, %v3471_v29, %v1588_v55  ;;  %v3542_v20 = vpop.permute.xlu0 %1404 }
 0x21f   : > { %v1847_v30 = vcombine.low %v1791_v11, %v1807_v33  ;;  %v1848_v54 = vcombine.high %v1791_v11, %v1807_v33  ;;  %v1814_v33 = vrot.slane %v1800_v32, %v2947_v34 }
 0x221   : > { %v1610_v3 = vpop.permute.xlu1 %1609  ;;  %2201 = vrot.lane.b32.xlu0 %v1777_v59, %s2681_s27  ;;  %v1816_v59 = vcombine.high %v1639_v24, %v1643_v63  ;;  %v3550_v51 = vrot.slane %v1847_v30, %v3011_v23  ;;  %v1742_v24 = vrot.slane %v1728_v42, %v3011_v23 }
 0x222   : > { %v1645_v47 = vsel %vm512_vm0, %v3473_v14, %v1610_v3  ;;  %v1760_v14 = vcombine.high %v1694_v45, %v1710_v43  ;;  %v1784_v43 = vcombine.high %v1631_v4, %v3513_v21  ;;  %v3560_v63 = vpop.permute.xlu0 %1426  ;;  %v1862_v21 = vrot.slane %v1848_v54, %v3011_v23 }
 0x223   : > { %v1831_v7 = vcombine.low %v1641_v25, %v1645_v47  ;;  %v1832_v29 = vcombine.high %v1641_v25, %v1645_v47  ;;  %v1830_v60 = vrot.slane %v1816_v59, %v2947_v34 }
 0x224   : > { %v1774_v45 = vrot.slane %v1760_v14, %v3011_v23  ;;  %v1798_v11 = vrot.slane %v1784_v43, %v2947_v34 }
 0x225   : > { %v1839_v18 = vrot.slane %v1831_v7, %v2947_v34  ;;  %v3545_v8 = vpop.permute.xlu1 %1283  ;;  %2209 = vrot.lane.b32.xlu0 %v1778_v31, %s2682_s29  ;;  %v1846_v25 = vrot.slane %v1832_v29, %v2947_v34 }
 0x226   : > { %v1781_v31 = vcombine.low %v1742_v24, %v1774_v45  ;;  %v1863_v19 = vcombine.low %v1798_v11, %v1814_v33  ;;  %v1449_v30 = vpop.permute.xlu0 %1448  ;;  %v1782_v29 = vcombine.high %v1742_v24, %v1774_v45  ;;  %v1864_v54 = vcombine.high %v1798_v11, %v1814_v33 }
 0x227   : > { %v1879_v55 = vcombine.low %v1823_v50, %v1839_v18  ;;  %v1880_v58 = vcombine.high %v1823_v50, %v1839_v18  ;;  %v1895_v38 = vcombine.low %v1830_v60, %v1846_v25  ;;  %v1896_v59 = vcombine.high %v1830_v60, %v1846_v25 }
 0x228   : > { %v1878_v45 = vrot.slane %v1864_v54, %v3011_v23 }
 0x229   : > { %v3553_v3 = vrot.slane %v1879_v55, %v3011_v23  ;;  %v1306_v7 = vpop.permute.xlu1 %1305  ;;  %2217 = vrot.lane.b32.xlu0 %v1779_v37, %s2683_s30  ;;  %v1894_v2 = vrot.slane %v1880_v58, %v3011_v23  ;;  %v1903_v14 = vrot.slane %v1895_v38, %v3011_v23  ;;  %v1871_v58 = vrot.slane %v1863_v19, %v3011_v23 }
 0x22a   : > { %v1471_v42 = vpop.permute.xlu0 %1470 }
 0x22b   : > { %v1912_v56 = vcombine.high %v3550_v51, %v3553_v3  ;;  %v1913_v50 = vcombine.low %v1862_v21, %v1894_v2  ;;  %v1914_v55 = vcombine.high %v1862_v21, %v1894_v2  ;;  %v1915_v32 = vcombine.low %v1871_v58, %v1903_v14 }
 0x22c   : > { %v1620_v19 = vsel %vm512_vm0, %v3477_v36, %v1471_v42 }
 0x22d   : > { %v1328_v4 = vpop.permute.xlu1 %1327  ;;  %2225 = vrot.lane.b32.xlu0 %v1780_v49, %s2684_s2  ;;  %2195 = vrot.lane.b32.xlu1 %v1912_v56, %s2680_s18  ;;  %v1910_v49 = vrot.slane %v1896_v59, %v3011_v23  ;;  %v1916_v56 = vcombine.high %v1871_v58, %v1903_v14  ;;  %v1616_v58 = vsel %vm512_vm0, %v3475_v10, %v1449_v30  ;;  %s2477_s18 = sshll.u32 %s2665_s9, 8  ;;  %s2696_s9 = smov [#allocation5]  }
 0x22e   : > { %v1493_v2 = vpop.permute.xlu0 %1492 }
 0x22f   : > { %v1917_v21 = vcombine.low %v1878_v45, %v1910_v49  ;;  %v1918_v60 = vcombine.high %v1878_v45, %v1910_v49  ;;  %v1624_v49 = vsel %vm512_vm0, %v3482_v62, %v1493_v2 }
 0x231   : > { %v1350_v18 = vpop.permute.xlu1 %1349  ;;  %2233 = vrot.lane.b32.xlu0 %v1781_v31, %s2685_s5  ;;  %2203 = vrot.lane.b32.xlu1 %v1913_v50, %s2681_s27  ;;  %s2368_s27 = sshll.u32 %s3766_s4, 4  ;;  %s3819_s27 = int_to_ptr.vmem [resolvable:$true] %s2368_s27 }
 0x232   : > { %v1515_v25 = vpop.permute.xlu0 %1514 }
 0x233   : > { %v1628_v59 = vsel %vm512_vm0, %v3491_v44, %v1515_v25 }
 0x235   : > { %v1372_v37 = vpop.permute.xlu1 %1371  ;;  %2241 = vrot.lane.b32.xlu0 %v1782_v29, %s2686_s12  ;;  %2211 = vrot.lane.b32.xlu1 %v1914_v55, %s2682_s29 }
 0x236   : > { %v1537_v11 = vpop.permute.xlu0 %1536 }
 0x239   : > { %v1394_v43 = vpop.permute.xlu1 %1393  ;;  %2219 = vrot.lane.b32.xlu1 %v1915_v32, %s2683_s30  ;;  %v1919_v32 = vcombine.low %v1616_v58, %v1620_v19 }
 0x23a   : > { %v1559_v54 = vpop.permute.xlu0 %1558 }
 0x23b   : > { %v1927_v45 = vrot.slane %v1919_v32, %v2947_v34 }
 0x23d   : > { %v3582_v24 = vpop.permute.xlu1 %1415  ;;  %2227 = vrot.lane.b32.xlu1 %v1916_v56, %s2684_s2 }
 0x23e   : > { %v1581_v30 = vpop.permute.xlu0 %1580 }
 0x241   : > { %v3585_v38 = vpop.permute.xlu1 %1437  ;;  %2235 = vrot.lane.b32.xlu1 %v1917_v21, %s2685_s5  ;;  %s3817_s5 = scalar_lea.hbm %s3871_s1, %s2477_s18 }
 0x245   : > { %v1460_v33 = vpop.permute.xlu1 %1459  ;;  %2243 = vrot.lane.b32.xlu1 %v1918_v60, %s2686_s12  ;;  %s2353_s12 = scalar_lea.sflag [#allocation4], %s2820_s26 }
 0x246   : > { %v1618_v14 = vsel %vm512_vm0, %v3545_v8, %v1460_v33 }
 0x249   : > { %v1482_v31 = vpop.permute.xlu1 %1481 }
 0x24a   : > { %v1622_v50 = vsel %vm512_vm0, %v1306_v7, %v1482_v31  ;;  %v1951_v7 = vcombine.low %v1624_v49, %v1628_v59 }
 0x24b   : > { %v1935_v29 = vcombine.low %v1618_v14, %v1622_v50  ;;  %v1936_v47 = vcombine.high %v1618_v14, %v1622_v50 }
 0x24c   : > { %v1959_v10 = vrot.slane %v1951_v7, %v2947_v34  ;;  %v3613_v7 = vsel %vm512_vm0, %v3528_v61, %v1559_v54  ;;  %v1640_v54 = vsel %vm512_vm0, %v3542_v20, %v1581_v30 }
 0x24d   : > { %v1504_v55 = vpop.permute.xlu1 %1503  ;;  %v1943_v56 = vrot.slane %v1935_v29, %v2947_v34 }
 0x24e   : > { %v1626_v42 = vsel %vm512_vm0, %v1328_v4, %v1504_v55 }
 0x24f   : > { %v1983_v44 = vcombine.low %v1927_v45, %v1943_v56  ;;  %v1984_v12 = vcombine.high %v1927_v45, %v1943_v56 }
 0x251   : > { %v1526_v36 = vpop.permute.xlu1 %1525  ;;  %v1991_v62 = vrot.slane %v1983_v44, %v3011_v23 }
 0x252   : > { %v1630_v8 = vsel %vm512_vm0, %v1350_v18, %v1526_v36  ;;  %v1603_v18 = vpop.permute.xlu0 %1602  ;;  %v1952_v36 = vcombine.high %v1624_v49, %v1628_v59 }
 0x253   : > { %v1967_v21 = vcombine.low %v1626_v42, %v1630_v8  ;;  %v1968_v29 = vcombine.high %v1626_v42, %v1630_v8  ;;  %v1632_v42 = vsel %vm512_vm0, %v3501_v41, %v1537_v11  ;;  %v1644_v59 = vsel %vm512_vm0, %v3560_v63, %v1603_v18 }
 0x254   : > { %v2055_v49 = vcombine.low %v1632_v42, %v3613_v7  ;;  %v1966_v14 = vrot.slane %v1952_v36, %v2947_v34  ;;  %v2087_v56 = vcombine.low %v1640_v54, %v1644_v59  ;;  %v1998_v41 = vrot.slane %v1984_v12, %v3011_v23 }
 0x255   : > { %v1975_v25 = vrot.slane %v1967_v21, %v2947_v34  ;;  %v1548_v60 = vpop.permute.xlu1 %1547  ;;  %v1982_v61 = vrot.slane %v1968_v29, %v2947_v34 }
 0x256   : > { %v1634_v21 = vsel %vm512_vm0, %v1372_v37, %v1548_v60  ;;  %v2063_v20 = vrot.slane %v2055_v49, %v2947_v34  ;;  %v2095_v12 = vrot.slane %v2087_v56, %v2947_v34 }
 0x257   : > { %v2015_v33 = vcombine.low %v1959_v10, %v1975_v25  ;;  %v2016_v55 = vcombine.high %v1959_v10, %v1975_v25  ;;  %v2031_v10 = vcombine.low %v1966_v14, %v1982_v61 }
 0x259   : > { %v2023_v2 = vrot.slane %v2015_v33, %v3011_v23  ;;  %v1570_v31 = vpop.permute.xlu1 %1569  ;;  %v2030_v37 = vrot.slane %v2016_v55, %v3011_v23  ;;  %v2032_v55 = vcombine.high %v1966_v14, %v1982_v61 }
 0x25a   : > { %v3609_v4 = vsel %vm512_vm0, %v1394_v43, %v1570_v31  ;;  %v1920_v43 = vcombine.high %v1616_v58, %v1620_v19  ;;  %v1950_v19 = vrot.slane %v1936_v47, %v2947_v34 }
 0x25b   : > { %v2047_v32 = vcombine.low %v1991_v62, %v2023_v2  ;;  %v2071_v44 = vcombine.low %v1634_v21, %v3609_v4  ;;  %v2048_v50 = vcombine.high %v1991_v62, %v2023_v2  ;;  %v2049_v47 = vcombine.low %v1998_v41, %v2030_v37 }
 0x25c   : > { %v1934_v58 = vrot.slane %v1920_v43, %v2947_v34  ;;  %v2039_v2 = vrot.slane %v2031_v10, %v3011_v23  ;;  %v2088_v43 = vcombine.high %v1640_v54, %v1644_v59 }
 0x25d   : > { %v1592_v33 = vpop.permute.xlu1 %1591  ;;  %2249 = vrot.lane.b32.xlu0 %v2047_v32, %s2687_s13  ;;  %v2079_v11 = vrot.slane %v2071_v44, %v2947_v34 }
 0x25e   : > { %v1642_v8 = vsel %vm512_vm0, %v3582_v24, %v1592_v33  ;;  %v1999_v25 = vcombine.low %v1934_v58, %v1950_v19  ;;  %v2050_v24 = vcombine.high %v1998_v41, %v2030_v37  ;;  %v2000_v49 = vcombine.high %v1934_v58, %v1950_v19 }
 0x25f   : > { %v2119_v60 = vcombine.low %v2063_v20, %v2079_v11  ;;  %v2120_v56 = vcombine.high %v2063_v20, %v2079_v11  ;;  %v2056_v37 = vcombine.high %v1632_v42, %v3613_v7  ;;  %v2046_v41 = vrot.slane %v2032_v55, %v3011_v23 }
 0x260   : > { %v2007_v18 = vrot.slane %v1999_v25, %v3011_v23  ;;  %v2102_v59 = vrot.slane %v2088_v43, %v2947_v34  ;;  %v2014_v54 = vrot.slane %v2000_v49, %v3011_v23  ;;  %v3909_v25 = vcombine.low %v3050_v53, %v3040_v46 }
 0x261   : > { %v1614_v63 = vpop.permute.xlu1 %1613  ;;  %2257 = vrot.lane.b32.xlu0 %v2048_v50, %s2688_s15  ;;  %v2072_v50 = vcombine.high %v1634_v21, %v3609_v4  ;;  %v2134_v21 = vrot.slane %v2120_v56, %v3011_v23  ;;  %v2070_v7 = vrot.slane %v2056_v37, %v2947_v34 }
 0x262   : > { %v1646_v45 = vsel %vm512_vm0, %v3585_v38, %v1614_v63  ;;  %v2127_v38 = vrot.slane %v2119_v60, %v3011_v23  ;;  %v2051_v44 = vcombine.low %v2007_v18, %v2039_v2  ;;  %v2052_v14 = vcombine.high %v2007_v18, %v2039_v2 }
 0x263   : > { %v2103_v30 = vcombine.low %v1642_v8, %v1646_v45  ;;  %v2104_v32 = vcombine.high %v1642_v8, %v1646_v45  ;;  %v2086_v4 = vrot.slane %v2072_v50, %v2947_v34  ;;  %v2053_v19 = vcombine.low %v2014_v54, %v2046_v41 }
 0x264   : > { %v2054_v20 = vcombine.high %v2014_v54, %v2046_v41  ;;  %vm1254_vm0 = vcmask 261120  }
 0x265   : > { %v2111_v62 = vrot.slane %v2103_v30, %v2947_v34  ;;  %2265 = vrot.lane.b32.xlu0 %v2049_v47, %s2689_s16  ;;  %v2118_v63 = vrot.slane %v2104_v32, %v2947_v34  ;;  %v2135_v58 = vcombine.low %v2070_v7, %v2086_v4 }
 0x267   : > { %v2151_v31 = vcombine.low %v2095_v12, %v2111_v62  ;;  %v2152_v36 = vcombine.high %v2095_v12, %v2111_v62  ;;  %v2167_v42 = vcombine.low %v2102_v59, %v2118_v63  ;;  %v2143_v30 = vrot.slane %v2135_v58, %v3011_v23 }
 0x268   : > { %v2168_v47 = vcombine.high %v2102_v59, %v2118_v63  ;;  %v2136_v12 = vcombine.high %v2070_v7, %v2086_v4 }
 0x269   : > { %v2159_v29 = vrot.slane %v2151_v31, %v3011_v23  ;;  %2273 = vrot.lane.b32.xlu0 %v2050_v24, %s2690_s17  ;;  %v2166_v61 = vrot.slane %v2152_v36, %v3011_v23  ;;  %v2175_v45 = vrot.slane %v2167_v42, %v3011_v23  ;;  %v3910_v31 = vcombine.high %v3050_v53, %v3040_v46 }
 0x26a   : > { %v2182_v60 = vrot.slane %v2168_v47, %v3011_v23  ;;  %v2150_v2 = vrot.slane %v2136_v12, %v3011_v23 }
 0x26b   : > { %v2183_v33 = vcombine.low %v2127_v38, %v2159_v29  ;;  %v2184_v8 = vcombine.high %v2127_v38, %v2159_v29  ;;  %v2185_v11 = vcombine.low %v2134_v21, %v2166_v61  ;;  %v2186_v10 = vcombine.high %v2134_v21, %v2166_v61 }
 0x26c   : > { %v2187_v34 = vcombine.low %v2143_v30, %v2175_v45  ;;  %v2188_v62 = vcombine.high %v2143_v30, %v2175_v45  ;;  %v2189_v24 = vcombine.low %v2150_v2, %v2182_v60  ;;  %v2190_v18 = vcombine.high %v2150_v2, %v2182_v60 }
 0x26d   : > { %2281 = vrot.lane.b32.xlu0 %v2051_v44, %s2691_s22  ;;  %2251 = vrot.lane.b32.xlu1 %v2183_v33, %s2687_s13  ;;  %v3911_v38 = vcombine.low %v3194_v48, %v3181_v6  ;;  %v3912_v29 = vcombine.high %v3194_v48, %v3181_v6  ;;  %v3914_v45 = vcombine.low %v3017_v13, %v3020_v1  ;;  %s2591_s13 = scalar_lea.vmem %s3819_s27, 256 }
 0x26e   : > { %p2592_p8 = scmp.ne.s32.totalorder %s3819_s27, %s2591_s13 }
 0x270   : > { %p2593_p11 = pnand %p2592_p8, %p3932_p9 }
 0x271   : > { %2289 = vrot.lane.b32.xlu0 %v2052_v14, %s2692_s23  ;;  %2259 = vrot.lane.b32.xlu1 %v2184_v8, %s2688_s15  ;;  %v3913_v14 = vcombine.low %v3496_v35, %v3499_v40  ;;  %s2595_s15 = sshll.u32 %s2696_s9, 4  ;;  %s2596_s15 = int_to_ptr.vmem [resolvable:$false] %s2595_s15 }
 0x272   : > { %p2594_p0 = pneg %p2593_p11  ;;  %p2598_p6 = scmp.lt.s32.totalorder %s3819_s27, %s2596_s15 }
 0x275   : > { %2297 = vrot.lane.b32.xlu0 %v2053_v19, %s2693_s24  ;;  %2267 = vrot.lane.b32.xlu1 %v2185_v11, %s2689_s16  ;;  %s2597_s16 = scalar_lea.vmem %s2596_s15, 512 }
 0x276   : > { %p2599_p13 = scmp.lt.s32.totalorder %s2597_s16, %s2591_s13 }
 0x278   : > { %p2600_p2 = por %p2599_p13, %p2598_p6 }
 0x279   : > { %2305 = vrot.lane.b32.xlu0 %v2054_v20, %s2694_s25  ;;  %2275 = vrot.lane.b32.xlu1 %v2186_v10, %s2690_s17  ;;  %v1210_v20 = vsel %vm1209_vm1, %v3914_v45, %v3370_v39 }
 0x27a   : > { %v1213_v30 = vsel %vm1212_vm2, %v1210_v20, %v3377_v15  ;;  %p2601_p5 = pnand %p2600_p2, %p2594_p0 }
 0x27d   : > { %1195 = vrot.lane.b32.xlu0 %v3909_v25, %s2693_s24  ;;  %2283 = vrot.lane.b32.xlu1 %v2187_v34, %s2691_s22  ;;  %v1216_v25 = vsel %vm1215_vm3, %v1213_v30, %v3384_v28 }
 0x27e   : > { %v1219_v13 = vsel %vm1218_vm4, %v1216_v25, %v3389_v26 }
 0x27f   : > { %v1222_v39 = vsel %vm1221_vm5, %v1219_v13, %v3393_v27  ;;  %v3929_v13 = vld [vmem:[#allocation20_spill] sm:$0xff] }
 0x280   : > { %v1225_v28 = vsel %vm1224_vm6, %v1222_v39, %v3397_v16  ;;  %v3915_v16 = vcombine.low %v3550_v51, %v3553_v3  ;;  %v3930_v39 = vld [vmem:[#allocation21_spill] sm:$0xff] }
 0x281   : > { %1203 = vrot.lane.b32.xlu0 %v3910_v31, %s2694_s25  ;;  %2291 = vrot.lane.b32.xlu1 %v2188_v62, %s2692_s23  ;;  %v1228_v26 = vsel %vm1227_vm7, %v1225_v28, %v3401_v5  ;;  %v3931_v28 = vld [vmem:[#allocation22_spill] sm:$0xff] }
 0x285   : > { %2299 = vrot.lane.b32.xlu1 %v2189_v24, %s2693_s24 }
 0x289   : > { %2307 = vrot.lane.b32.xlu1 %v2190_v18, %s2694_s25  ;;  %v1231_v18 = vsel %vm1230_vm8, %v1228_v26, %v3405_v57 }
 0x28a   : > { %v1234_v27 = vsel %vm1233_vm9, %v1231_v18, %v3410_v9 }
 0x28b   : > { %v1237_v5 = vsel %vm1236_vm10, %v1234_v27, %v3416_v17 }
 0x28d   : > { %1197 = vrot.lane.b32.xlu1 %v3911_v38, %s2693_s24 }
 0x28f   : > { %v2194_v55 = vpop.permute.xlu0 %2193 }
 0x290   : > { %v2311_v8 = vsel %vm1209_vm1, %v3913_v14, %v2194_v55 }
 0x291   : > { %1205 = vrot.lane.b32.xlu1 %v3912_v29, %s2694_s25 }
 0x293   : > { %v2202_v23 = vpop.permute.xlu0 %2201 }
 0x294   : > { %v2313_v59 = vsel %vm1212_vm2, %v2311_v8, %v2202_v23  ;;  %v1240_v23 = vsel %vm1239_vm11, %v1237_v5, %v3422_v52 }
 0x295   : > { %v1243_v51 = vsel %vm1242_vm12, %v1240_v23, %v3428_v22 }
 0x296   : > { %v1246_v17 = vsel %vm1245_vm14, %v1243_v51, %v3434_v0  ;;  %v3916_v0 = vld [vmem:[#allocation8_spill] sm:$0xff] }
 0x297   : > { %v2210_v32 = vpop.permute.xlu0 %2209 }
 0x298   : > { %v2315_v21 = vsel %vm1215_vm3, %v2313_v59, %v2210_v32  ;;  %v3922_v59 = vld [vmem:[#allocation13_spill] sm:$0xff] }
 0x29b   : > { %v2218_v46 = vpop.permute.xlu0 %2217 }
 0x29c   : > { %v2317_v7 = vsel %vm1218_vm4, %v2315_v21, %v2218_v46  ;;  %v3923_v21 = vld [vmem:[#allocation14_spill] sm:$0xff] }
 0x29f   : > { %v3680_v36 = vpop.permute.xlu1 %2195  ;;  %v2226_v44 = vpop.permute.xlu0 %2225 }
 0x2a0   : > { %v2319_v42 = vsel %vm1221_vm5, %v2317_v7, %v2226_v44  ;;  %v2312_v38 = vsel %vm1209_vm1, %v3915_v16, %v3680_v36 }
 0x2a3   : > { %v3682_v53 = vpop.permute.xlu1 %2203  ;;  %v2234_v43 = vpop.permute.xlu0 %2233 }
 0x2a4   : > { %v2321_v35 = vsel %vm1224_vm6, %v2319_v42, %v2234_v43  ;;  %v2314_v29 = vsel %vm1212_vm2, %v2312_v38, %v3682_v53  ;;  %v3917_v43 = vld [vmem:[#allocation11_spill] sm:$0xff] }
 0x2a7   : > { %v3684_v33 = vpop.permute.xlu1 %2211  ;;  %v2242_v50 = vpop.permute.xlu0 %2241 }
 0x2a8   : > { %v2323_v11 = vsel %vm1227_vm7, %v2321_v35, %v2242_v50  ;;  %v2316_v9 = vsel %vm1215_vm3, %v2314_v29, %v3684_v33  ;;  %v3924_v35 = vld [vmem:[#allocation15_spill] sm:$0xff] }
 0x2ab   : > { %v3686_v49 = vpop.permute.xlu1 %2219 }
 0x2ac   : > { %v2318_v3 = vsel %vm1218_vm4, %v2316_v9, %v3686_v49  ;;  %v3918_v49 = vld [vmem:[#allocation12_spill] sm:$0xff] }
 0x2ad   : > { %v3919_v50 = vcombine.low %v3917_v43, %v3918_v49 }
 0x2af   : > { %v3688_v56 = vpop.permute.xlu1 %2227 }
 0x2b0   : > { %v2320_v32 = vsel %vm1221_vm5, %v2318_v3, %v3688_v56  ;;  %v1211_v56 = vsel %vm1209_vm1, %v3919_v50, %v3916_v0  ;;  %vm2349_vm1 = vcmask 523520  }
 0x2b3   : > { %v3690_v48 = vpop.permute.xlu1 %2235 }
 0x2b4   : > { %v2322_v36 = vsel %vm1224_vm6, %v2320_v32, %v3690_v48 }
 0x2b7   : > { %v3692_v63 = vpop.permute.xlu1 %2243 }
 0x2b8   : > { %v2324_v22 = vsel %vm1227_vm7, %v2322_v36, %v3692_v63 }
 0x2cf   : > { %v2250_v37 = vpop.permute.xlu0 %2249 }
 0x2d0   : > { %v2325_v58 = vsel %vm1230_vm8, %v2323_v11, %v2250_v37 }
 0x2d3   : > { %v2258_v6 = vpop.permute.xlu0 %2257 }
 0x2d4   : > { %v2327_v10 = vsel %vm1233_vm9, %v2325_v58, %v2258_v6  ;;  %v3920_v6 = vld [vmem:[#allocation9_spill] sm:$0xff]  ;;  %v3925_v58 = vld [vmem:[#allocation16_spill] sm:$0xff] }
 0x2d5   : > { %v1214_v48 = vsel %vm1212_vm2, %v1211_v56, %v3920_v6 }
 0x2d7   : > { %v2266_v41 = vpop.permute.xlu0 %2265 }
 0x2d8   : > { %v2329_v47 = vsel %vm1236_vm10, %v2327_v10, %v2266_v41  ;;  %v3926_v10 = vld [vmem:[#allocation17_spill] sm:$0xff] }
 0x2db   : > { %v2274_v61 = vpop.permute.xlu0 %2273 }
 0x2dc   : > { %v2331_v60 = vsel %vm1239_vm11, %v2329_v47, %v2274_v61  ;;  %v3921_v61 = vld [vmem:[#allocation10_spill] sm:$0xff] }
 0x2dd   : > { %v1217_v14 = vsel %vm1215_vm3, %v1214_v48, %v3921_v61  ;;  %v3927_v47 = vld [vmem:[#allocation18_spill] sm:$0xff] }
 0x2df   : > { %v3699_v54 = vpop.permute.xlu1 %2251  ;;  %v2282_v4 = vpop.permute.xlu0 %2281 }
 0x2e0   : > { %v2333_v1 = vsel %vm1242_vm12, %v2331_v60, %v2282_v4  ;;  %v2326_v33 = vsel %vm1230_vm8, %v2324_v22, %v3699_v54  ;;  %v1220_v54 = vsel %vm1218_vm4, %v1217_v14, %v3922_v59 }
 0x2e1   : > { %v1223_v7 = vsel %vm1221_vm5, %v1220_v54, %v3923_v21 }
 0x2e3   : > { %v2260_v40 = vpop.permute.xlu1 %2259  ;;  %v2290_v19 = vpop.permute.xlu0 %2289 }
 0x2e4   : > { %v2335_v15 = vsel %vm1245_vm14, %v2333_v1, %v2290_v19  ;;  %v2328_v37 = vsel %vm1233_vm9, %v2326_v33, %v2260_v40  ;;  %v1226_v40 = vsel %vm1224_vm6, %v1223_v7, %v3924_v35 }
 0x2e5   : > { %v1229_v45 = vsel %vm1227_vm7, %v1226_v40, %v3925_v58 }
 0x2e6   : > { %v1232_v30 = vsel %vm1230_vm8, %v1229_v45, %v3926_v10 }
 0x2e7   : > { %v2268_v34 = vpop.permute.xlu1 %2267  ;;  %v2298_v12 = vpop.permute.xlu0 %2297 }
 0x2e8   : > { %v2337_v62 = vsel %vm1248_vm13, %v2335_v15, %v2298_v12  ;;  %v2330_v41 = vsel %vm1236_vm10, %v2328_v37, %v2268_v34  ;;  %v1235_v34 = vsel %vm1233_vm9, %v1232_v30, %v3927_v47  ;;  %v3928_v12 = vld [vmem:[#allocation19_spill] sm:$0xff] }
 0x2e9   : > { %v1238_v25 = vsel %vm1236_vm10, %v1235_v34, %v3928_v12 }
 0x2ea   : > { %v1241_v1 = vsel %vm1239_vm11, %v1238_v25, %v3929_v13 }
 0x2eb   : > { %v2276_v2 = vpop.permute.xlu1 %2275  ;;  %v2306_v31 = vpop.permute.xlu0 %2305  ;;  %v1244_v15 = vsel %vm1242_vm12, %v1241_v1, %v3930_v39 }
 0x2ec   : > { %v2339_v24 = vsel %vm1251_vm15, %v2337_v62, %v2306_v31  ;;  %v2332_v8 = vsel %vm1239_vm11, %v2330_v41, %v2276_v2  ;;  %v1247_v62 = vsel %vm1245_vm14, %v1244_v15, %v3931_v28 }
 0x2ed   : > { %2343 = vrot.lane.b32.xlu0 %v2339_v24, %s2695_s28 }
 0x2ef   : > { %v2284_v55 = vpop.permute.xlu1 %2283  ;;  %v1196_v57 = vpop.permute.xlu0 %1195 }
 0x2f0   : > { %v1249_v52 = vsel %vm1248_vm13, %v1246_v17, %v1196_v57  ;;  %v2334_v4 = vsel %vm1242_vm12, %v2332_v8, %v2284_v55 }
 0x2f3   : > { %v2292_v46 = vpop.permute.xlu1 %2291  ;;  %v1204_v53 = vpop.permute.xlu0 %1203 }
 0x2f4   : > { %v1252_v44 = vsel %vm1251_vm15, %v1249_v52, %v1204_v53  ;;  %v2336_v42 = vsel %vm1245_vm14, %v2334_v4, %v2292_v46 }
 0x2f5   : > { %1255 = vst.msk [vmem:[%s3766_s4] sm:$0xff] %vm1254_vm0, %v1252_v44 }
 0x2f7   : > { %v2300_v63 = vpop.permute.xlu1 %2299 }
 0x2f8   : > { %v2338_v19 = vsel %vm1248_vm13, %v2336_v42, %v2300_v63 }
 0x2fb   : > { %v2308_v11 = vpop.permute.xlu1 %2307 }
 0x2fc   : > { %v2340_v20 = vsel %vm1251_vm15, %v2338_v19, %v2308_v11 }
 0x2fd   : > { %2345 = vrot.lane.b32.xlu1 %v2340_v20, %s2695_s28 }
 0x2ff   : > { %v1198_v60 = vpop.permute.xlu1 %1197 }
 0x300   : > { %v1250_v2 = vsel %vm1248_vm13, %v1247_v62, %v1198_v60 }
 0x303   : > { %v1206_v31 = vpop.permute.xlu1 %1205 }
 0x304   : > { %v1253_v26 = vsel %vm1251_vm15, %v1250_v2, %v1206_v31 }
 0x305   : > { %1256 = vst.msk [vmem:[%s3766_s4 + $0x8] sm:$0xff] %vm1254_vm0, %v1253_v26 }
 0x35f   : > { %v2344_v24 = vpop.permute.xlu0 %2343 }
 0x360   : > { %2350 = vst.msk [vmem:[%s3766_s4] sm:$0xff] %vm2349_vm1, %v2344_v24 }
 0x36f   : > { %v2346_v18 = vpop.permute.xlu1 %2345 }
 0x370   : > { %2351 = vst.msk [vmem:[%s3766_s4 + $0x8] sm:$0xff] %vm2349_vm1, %v2346_v18 }
 0x371   : > { %2604 = shalt.err (!%p2601_p5)
}
 0x372   : > { %s2605_s17 = scalar_lea.hbm %s3817_s5, 256  ;;  %s2609_s24 = scalar_lea.hbm %s3871_s1, 512 }
 0x373   : > { %p2606_p4 = scmp.ne.s32.totalorder %s3817_s5, %s2605_s17  ;;  %p2610_p12 = scmp.lt.u32.totalorder %s3817_s5, %s3871_s1 }
 0x374   : > { %p2611_p1 = scmp.lt.u32.totalorder %s2609_s24, %s2605_s17  ;;  %p2613_p8 = scmp.lt.u32.totalorder %s2605_s17, %s3817_s5 }
 0x375   : > { %p2607_p7 = pnand %p2606_p4, %p3932_p9 }
 0x376   : > { %p2612_p3 = por %p2611_p1, %p2610_p12 }
 0x377   : > { %p2608_p10 = pneg %p2607_p7 }
 0x378   : > { %p2614_p11 = por %p2613_p8, %p2612_p3 }
 0x37a   : > { %p2615_p0 = pnand %p2614_p11, %p2608_p10 }
 0x37c   : > { %2618 = shalt.err (!%p2615_p0)
}
 0x37d   : > { %s2697_s3 = smov 128  }
 0x37e   : > { %2480 = dma.vmem_to_hbm [thread:$0]  (%p3932_p9), %s3819_s27, 256, %s3817_s5, %s2353_s12, %s2697_s3, %s2697_s3, %s2683_s30  }
 0x37f PF: > { %s2383_s4 = sand.u32 1, %s2653_s6   ;;  %p3933_p6 = scmp.ne.s32.totalorder %s3884_s21, 0 }
 0x380   : > { %p3934_p13 = scmp.ge.s32.totalorder %s2673_s11, 2  ;;  %s2384_s18 = scalar_lea.sflag [#allocation4], %s2383_s4 }
 0x382   : > { %p2487_p2 = pnand %p3934_p13, %p3933_p6 }
 0x384   : > { %2648 = dma.done.wait (!%p2487_p2), %s2384_s18, 256  }
 0x385   : > { %2650 = vsyncadd (!%p2487_p2), %s2384_s18, 4294967040  ;;  %s17_s11 = sadd.s32 1, %s2673_s11   ;;  %s3935_s6 = smov %s2657_s7 }
 0x386   : > { %p14_p5 = scmp.ge.s32.totalorder %s17_s11, 4   ;;  %s3936_s7 = smov %s2661_s8 }
 0x387   : > { %s3937_s8 = smov %s2764_s20  ;;  %s3938_s9 = smov %s2669_s10 }
 0x388   : > { %s3939_s10 = smov %s3941_s14  ;;  %16 = sbr.rel (!%p14_p5) target bundleno = 6 (0x6), region = 72 }
 0x38f   :  { %2389 = vsyncpa [#allocation3], 1 }
 0x390   :  { %2391 = vsyncpa [#allocation3 + $0x1], 1 }
 0x391   :  { %2392 = vsyncpa [#allocation4], 1 }
 0x392   :  { %2394 = vsyncpa [#allocation4 + $0x1], 1 }

</bundles_post_ra>
